<compile_context>
chip_gen: v6e
topology: v6e:2x2x1
jax: 0.10.0
libtpu: 0.0.40
codegen_flags: <defaults>
</compile_context>

<pallas_src>
import math

import jax
import jax.numpy as jnp
from jax import lax
from jax.experimental import pallas as pl
from jax.experimental.pallas import tpu as pltpu

SUBLANE = 8


def _round_up(n, m):
    return ((n + m - 1) // m) * m


def make_lstm_kernel(num_layers, seq_len, batch_pad, feat_dim, hidden, unroll):
    """Builds the Pallas kernel.

    Kernel refs (in order):
      x_ref (T, Bp, F),
      per layer l: w_ih (K_l, 4H), w_hh (H, 4H), b (1, 4H)   [compact gate packing],
      fc_w (1, H), fc_b (1, 1),
      out_ref (Bp, 1),
      scratch: proj (T, Bp, 4H), seq (T, Bp, H).
    """
    T, Bp, F, H = seq_len, batch_pad, feat_dim, hidden
    G = 4 * H
    TB = T * Bp

    def kernel(x_ref, *rest):
        layer_refs = rest[: 3 * num_layers]
        fc_w_ref = rest[3 * num_layers]
        fc_b_ref = rest[3 * num_layers + 1]
        out_ref = rest[3 * num_layers + 2]
        proj_ref = rest[3 * num_layers + 3]
        seq_ref = rest[3 * num_layers + 4]

        # Loop-invariant lane mask selecting the tanh ("g") gate block. Hoisted once so the
        # broadcast is not re-materialized per timestep.
        lane = lax.broadcasted_iota(jnp.int32, (Bp, G), 1)
        is_g = jnp.logical_and(lane >= 2 * H, lane < 3 * H)

        h_last = jnp.zeros((Bp, H), jnp.float32)
        for l in range(num_layers):
            w_ih_ref = layer_refs[3 * l]
            w_hh_ref = layer_refs[3 * l + 1]
            b_ref = layer_refs[3 * l + 2]

            # --- Hoisted input projection: one (T*Bp, K) @ (K, 4H) matmul per layer (+bias). ---
            if l == 0:
                inp = x_ref[...].reshape(TB, F)
            else:
                inp = seq_ref[...].reshape(TB, H)
            proj = (
                jnp.dot(inp, w_ih_ref[...], preferred_element_type=jnp.float32)
                + b_ref[...]
            )
            proj_ref[...] = proj.reshape(T, Bp, G)

            # --- Recurrence: only (Bp,H)@(H,4H) + gate math stays on the serial path. ---
            w_hh = w_hh_ref[...]  # loaded once per layer, held across the time loop

            def step(t, carry, l=l):
                h, c = carry
                gates = proj_ref[t] + jnp.dot(
                    h, w_hh, preferred_element_type=jnp.float32
                )  # (Bp, 4H), PyTorch gate order i, f, g, o packed in one 128-lane block
                # One EUP tanh for all four gates:
                #   i/f/o lanes: sigmoid(x) = 0.5*tanh(0.5*x) + 0.5 ;  g lanes: tanh(x).
                arg = jnp.where(is_g, gates, 0.5 * gates)
                th = jnp.tanh(arg)
                act = jnp.where(is_g, th, 0.5 * th + 0.5)
                i_g = act[:, 0:H]
                f_g = act[:, H:2 * H]
                g_g = act[:, 2 * H:3 * H]
                o_g = act[:, 3 * H:4 * H]
                c_new = f_g * c + i_g * g_g
                h_new = o_g * jnp.tanh(c_new)
                if l < num_layers - 1:
                    seq_ref[t] = h_new  # staged input for the next layer (skipped on top layer)
                return (h_new, c_new)

            h0 = jnp.zeros((Bp, H), jnp.float32)
            c0 = jnp.zeros((Bp, H), jnp.float32)
            h_last, _ = lax.fori_loop(0, T, step, (h0, c0), unroll=unroll)

        # --- FC head: VPU multiply + lane reduction instead of an N=1 MXU matmul. ---
        out_ref[...] = (
            jnp.sum(h_last * fc_w_ref[...], axis=-1, keepdims=True) + fc_b_ref[...]
        )

    return kernel


def init_params(key, input_size, hidden_size, num_layers):
    """Deterministic parameter init matching PyTorch nn.LSTM / nn.Linear shapes."""
    k = 1.0 / math.sqrt(hidden_size)
    params = {"lstm": []}
    for l in range(num_layers):
        in_dim = input_size if l == 0 else hidden_size
        key, k1, k2, k3, k4 = jax.random.split(key, 5)
        w_ih = jax.random.uniform(k1, (4 * hidden_size, in_dim), jnp.float32, -k, k)
        w_hh = jax.random.uniform(k2, (4 * hidden_size, hidden_size), jnp.float32, -k, k)
        b_ih = jax.random.uniform(k3, (4 * hidden_size,), jnp.float32, -k, k)
        b_hh = jax.random.uniform(k4, (4 * hidden_size,), jnp.float32, -k, k)
        params["lstm"].append((w_ih, w_hh, b_ih, b_hh))
    key, k5, k6 = jax.random.split(key, 3)
    kf = 1.0 / math.sqrt(hidden_size)
    params["fc_w"] = jax.random.uniform(k5, (1, hidden_size), jnp.float32, -kf, kf)
    params["fc_b"] = jax.random.uniform(k6, (1,), jnp.float32, -kf, kf)
    return params


def pack_params(params):
    """One-time (outside jit) weight packing: transpose to (in_dim, 4H), combine biases.
    Compact gate packing: the four H-wide gates sit contiguously in one 4H-lane block
    (4H = 128 for H = 32), with NO per-gate padding."""
    layers = []
    for (w_ih, w_hh, b_ih, b_hh) in params["lstm"]:
        w_ih_p = jnp.transpose(w_ih).astype(jnp.float32)            # (in_dim, 4H)
        w_hh_p = jnp.transpose(w_hh).astype(jnp.float32)            # (H, 4H)
        b_p = (b_ih + b_hh).astype(jnp.float32).reshape(1, -1)      # (1, 4H)
        layers.append((w_ih_p, w_hh_p, b_p))
    fc_w_p = params["fc_w"].astype(jnp.float32).reshape(1, -1)      # (1, H)
    fc_b_p = params["fc_b"].astype(jnp.float32).reshape(1, 1)       # (1, 1)
    return {"layers": tuple(layers), "fc_w": fc_w_p, "fc_b": fc_b_p}


@jax.jit
def lstm_model_forward(x, packed):
    """Pallas implementation of LSTMModel.forward. x: (B, T, F) -> (B, 1)."""
    B, T, F = x.shape
    layers = packed["layers"]
    fc_w = packed["fc_w"]
    fc_b = packed["fc_b"]
    num_layers = len(layers)
    H = fc_w.shape[1]
    G = 4 * H
    Bp = _round_up(max(B, SUBLANE), SUBLANE)

    # Time-major + pad batch to 8 sublanes: one transpose + one pad op. Feature/hidden
    # contraction dims stay unpadded (MXU handles small K).
    x_tm = jnp.transpose(x.astype(jnp.float32), (1, 0, 2))      # (T, B, F)
    x_pad = jnp.pad(x_tm, ((0, 0), (0, Bp - B), (0, 0)))        # (T, Bp, F)

    args = [x_pad]
    for (w_ih, w_hh, b) in layers:
        args += [w_ih, w_hh, b]
    args += [fc_w, fc_b]

    # Full unroll for short sequences, partial unroll (scheduler visibility, bounded vreg
    # live ranges) for long ones.
    unroll = T if T <= 16 else 8
    kernel = make_lstm_kernel(num_layers, T, Bp, F, H, unroll)
    vmem = pl.BlockSpec(memory_space=pltpu.MemorySpace.VMEM)
    # TODO(synk): for large B on v7x, add a leading batch grid axis with
    # dimension_semantics=("parallel",) to use both TensorCores, and chunk proj_ref over T
    # (v7x has only 64 MiB VMEM); unnecessary at these shapes (<100 KiB total VMEM).
    out_p = pl.pallas_call(
        kernel,
        out_shape=jax.ShapeDtypeStruct((Bp, 1), jnp.float32),
        in_specs=[vmem] * len(args),
        out_specs=vmem,
        scratch_shapes=[
            pltpu.VMEM((T, Bp, G), jnp.float32),  # hoisted input projection, all timesteps
            pltpu.VMEM((T, Bp, H), jnp.float32),  # layer output sequence (next layer's input)
        ],
    )(*args)
    return out_p[:B]


def lstm_model_reference(x, params, *, hidden_size, num_layers):
    """Pure-JAX reference of the same forward pass (for verification)."""
    B, T, F = x.shape
    H = hidden_size
    seq = x.astype(jnp.float32)
    for l in range(num_layers):
        w_ih, w_hh, b_ih, b_hh = params["lstm"][l]
        h = jnp.zeros((B, H), jnp.float32)
        c = jnp.zeros((B, H), jnp.float32)
        outs = []
        for t in range(T):
            gates = seq[:, t, :] @ w_ih.T + h @ w_hh.T + b_ih + b_hh
            i_g = jax.nn.sigmoid(gates[:, 0:H])
            f_g = jax.nn.sigmoid(gates[:, H:2 * H])
            g_g = jnp.tanh(gates[:, 2 * H:3 * H])
            o_g = jax.nn.sigmoid(gates[:, 3 * H:4 * H])
            c = f_g * c + i_g * g_g
            h = o_g * jnp.tanh(c)
            outs.append(h)
        seq = jnp.stack(outs, axis=1)  # (B, T, H)
    return seq[:, -1, :] @ params["fc_w"].T + params["fc_b"]


if __name__ == "__main__":
    # Small shapes consistent with the module's forward: (batch, seq, input_size)
    B, T, INPUT_SIZE, HIDDEN_SIZE, NUM_LAYERS = 2, 8, 16, 32, 2

    key = jax.random.PRNGKey(0)
    x_key, p_key = jax.random.split(key)
    x = jax.random.normal(x_key, (B, T, INPUT_SIZE), dtype=jnp.float32)
    params = init_params(p_key, INPUT_SIZE, HIDDEN_SIZE, NUM_LAYERS)

    # Weight packing happens once, outside the jitted forward (no per-call transposes).
    packed = pack_params(params)

    out = lstm_model_forward(x, packed)
    out = jax.block_until_ready(out)

    ref = lstm_model_reference(x, params, hidden_size=HIDDEN_SIZE, num_layers=NUM_LAYERS)
    assert out.shape == (B, 1), out.shape
    assert jnp.allclose(out, ref, rtol=1e-4, atol=1e-4), (out, ref)

    print("KERNEL_OK")
</pallas_src>

<mosaic_0001>
module attributes {stable_mosaic.version = 11 : i64} {
  func.func @kernel(%arg0: memref<8x8x16xf32, #tpu.memory_space<vmem>>, %arg1: memref<16x128xf32, #tpu.memory_space<vmem>>, %arg2: memref<32x128xf32, #tpu.memory_space<vmem>>, %arg3: memref<1x128xf32, #tpu.memory_space<vmem>>, %arg4: memref<32x128xf32, #tpu.memory_space<vmem>>, %arg5: memref<32x128xf32, #tpu.memory_space<vmem>>, %arg6: memref<1x128xf32, #tpu.memory_space<vmem>>, %arg7: memref<1x32xf32, #tpu.memory_space<vmem>>, %arg8: memref<1x1xf32, #tpu.memory_space<vmem>>, %arg9: memref<8x1xf32, #tpu.memory_space<vmem>>, %arg10: memref<8x8x128xf32, #tpu.memory_space<vmem>>, %arg11: memref<8x8x32xf32, #tpu.memory_space<vmem>>) attributes {dimension_semantics = [], scalar_prefetch = 0 : i64, scratch_operands = 2 : i64, tpu.core_type = #tpu.core_type<tc>} {
    %0 = tpu.iota {dimensions = array<i32: 1>} : vector<8x128xi32>
    %c64_i32 = arith.constant 64 : i32
    %1 = vector.broadcast %c64_i32 : i32 to vector<8x128xi32>
    %2 = arith.cmpi sge, %0, %1 : vector<8x128xi32>
    %c96_i32 = arith.constant 96 : i32
    %3 = vector.broadcast %c96_i32 : i32 to vector<8x128xi32>
    %4 = arith.cmpi slt, %0, %3 : vector<8x128xi32>
    %5 = arith.andi %2, %4 : vector<8x128xi1>
    %c0 = arith.constant 0 : index
    %c0_0 = arith.constant 0 : index
    %c0_1 = arith.constant 0 : index
    %6 = vector.load %arg0[%c0, %c0_0, %c0_1] : memref<8x8x16xf32, #tpu.memory_space<vmem>>, vector<8x8x16xf32>
    %7 = vector.shape_cast %6 : vector<8x8x16xf32> to vector<64x16xf32>
    %c0_2 = arith.constant 0 : index
    %c0_3 = arith.constant 0 : index
    %8 = vector.load %arg1[%c0_2, %c0_3] : memref<16x128xf32, #tpu.memory_space<vmem>>, vector<16x128xf32>
    %cst = arith.constant dense<0.000000e+00> : vector<64x128xf32>
    %9 = tpu.matmul %7, %8, %cst {dimension_numbers = #tpu.dot_dimension_numbers<[1], [0], [0], [1], [0, 0, 1, 1], [], []>} : vector<64x16xf32>, vector<16x128xf32>, vector<64x128xf32> -> vector<64x128xf32>
    %c0_4 = arith.constant 0 : index
    %c0_5 = arith.constant 0 : index
    %10 = vector.load %arg3[%c0_4, %c0_5] : memref<1x128xf32, #tpu.memory_space<vmem>>, vector<1x128xf32>
    %11 = vector.broadcast %10 : vector<1x128xf32> to vector<64x128xf32>
    %12 = arith.addf %9, %11 : vector<64x128xf32>
    %13 = vector.shape_cast %12 : vector<64x128xf32> to vector<8x8x128xf32>
    %c0_6 = arith.constant 0 : index
    %c0_7 = arith.constant 0 : index
    %c0_8 = arith.constant 0 : index
    %14 = vector.load %arg10[%c0_6, %c0_7, %c0_8] : memref<8x8x128xf32, #tpu.memory_space<vmem>>, vector<8x8x128xf32>
    tpu.vector_store %arg10[%c0_6, %c0_7, %c0_8], %13 {strides = array<i32>} : memref<8x8x128xf32, #tpu.memory_space<vmem>>, vector<8x8x128xf32>,
    %c0_9 = arith.constant 0 : index
    %c0_10 = arith.constant 0 : index
    %15 = vector.load %arg2[%c0_9, %c0_10] : memref<32x128xf32, #tpu.memory_space<vmem>>, vector<32x128xf32>
    %cst_11 = arith.constant 0.000000e+00 : f32
    %16 = vector.broadcast %cst_11 : f32 to vector<8x32xf32>
    %cst_12 = arith.constant 0.000000e+00 : f32
    %17 = vector.broadcast %cst_12 : f32 to vector<8x32xf32>
    %c0_i32 = arith.constant 0 : i32
    %18 = arith.index_cast %c0_i32 : i32 to index
    %c0_13 = arith.constant 0 : index
    %c0_14 = arith.constant 0 : index
    %19 = vector.load %arg10[%18, %c0_13, %c0_14] : memref<8x8x128xf32, #tpu.memory_space<vmem>>, vector<1x8x128xf32>
    %20 = vector.shape_cast %19 : vector<1x8x128xf32> to vector<8x128xf32>
    %cst_15 = arith.constant dense<0.000000e+00> : vector<8x128xf32>
    %21 = tpu.matmul %16, %15, %cst_15 {dimension_numbers = #tpu.dot_dimension_numbers<[1], [0], [0], [1], [0, 0, 1, 1], [], []>} : vector<8x32xf32>, vector<32x128xf32>, vector<8x128xf32> -> vector<8x128xf32>
    %22 = arith.addf %20, %21 : vector<8x128xf32>
    %cst_16 = arith.constant 5.000000e-01 : f32
    %23 = vector.broadcast %cst_16 : f32 to vector<8x128xf32>
    %24 = arith.mulf %23, %22 : vector<8x128xf32>
    %25 = arith.select %5, %22, %24 : vector<8x128xi1>, vector<8x128xf32>
    %26 = math.tanh %25 : vector<8x128xf32>
    %cst_17 = arith.constant 5.000000e-01 : f32
    %27 = vector.broadcast %cst_17 : f32 to vector<8x128xf32>
    %28 = arith.mulf %27, %26 : vector<8x128xf32>
    %cst_18 = arith.constant 5.000000e-01 : f32
    %29 = vector.broadcast %cst_18 : f32 to vector<8x128xf32>
    %30 = arith.addf %28, %29 : vector<8x128xf32>
    %31 = arith.select %5, %26, %30 : vector<8x128xi1>, vector<8x128xf32>
    %32 = vector.extract_strided_slice %31 {offsets = [0, 0], sizes = [8, 32], strides = [1, 1]} : vector<8x128xf32> to vector<8x32xf32>
    %33 = vector.extract_strided_slice %31 {offsets = [0, 32], sizes = [8, 32], strides = [1, 1]} : vector<8x128xf32> to vector<8x32xf32>
    %34 = vector.extract_strided_slice %31 {offsets = [0, 64], sizes = [8, 32], strides = [1, 1]} : vector<8x128xf32> to vector<8x32xf32>
    %35 = vector.extract_strided_slice %31 {offsets = [0, 96], sizes = [8, 32], strides = [1, 1]} : vector<8x128xf32> to vector<8x32xf32>
    %36 = arith.mulf %33, %17 : vector<8x32xf32>
    %37 = arith.mulf %32, %34 : vector<8x32xf32>
    %38 = arith.addf %36, %37 : vector<8x32xf32>
    %39 = math.tanh %38 : vector<8x32xf32>
    %40 = arith.mulf %35, %39 : vector<8x32xf32>
    %41 = arith.index_cast %c0_i32 : i32 to index
    %c0_19 = arith.constant 0 : index
    %c0_20 = arith.constant 0 : index
    %42 = vector.load %arg11[%41, %c0_19, %c0_20] : memref<8x8x32xf32, #tpu.memory_space<vmem>>, vector<1x8x32xf32>
    %43 = vector.shape_cast %42 : vector<1x8x32xf32> to vector<8x32xf32>
    %44 = vector.shape_cast %40 : vector<8x32xf32> to vector<1x8x32xf32>
    tpu.vector_store %arg11[%41, %c0_19, %c0_20], %44 {strides = array<i32>} : memref<8x8x32xf32, #tpu.memory_space<vmem>>, vector<1x8x32xf32>,
    %c1_i32 = arith.constant 1 : i32
    %45 = arith.index_cast %c1_i32 : i32 to index
    %c0_21 = arith.constant 0 : index
    %c0_22 = arith.constant 0 : index
    %46 = vector.load %arg10[%45, %c0_21, %c0_22] : memref<8x8x128xf32, #tpu.memory_space<vmem>>, vector<1x8x128xf32>
    %47 = vector.shape_cast %46 : vector<1x8x128xf32> to vector<8x128xf32>
    %cst_23 = arith.constant dense<0.000000e+00> : vector<8x128xf32>
    %48 = tpu.matmul %40, %15, %cst_23 {dimension_numbers = #tpu.dot_dimension_numbers<[1], [0], [0], [1], [0, 0, 1, 1], [], []>} : vector<8x32xf32>, vector<32x128xf32>, vector<8x128xf32> -> vector<8x128xf32>
    %49 = arith.addf %47, %48 : vector<8x128xf32>
    %cst_24 = arith.constant 5.000000e-01 : f32
    %50 = vector.broadcast %cst_24 : f32 to vector<8x128xf32>
    %51 = arith.mulf %50, %49 : vector<8x128xf32>
    %52 = arith.select %5, %49, %51 : vector<8x128xi1>, vector<8x128xf32>
    %53 = math.tanh %52 : vector<8x128xf32>
    %cst_25 = arith.constant 5.000000e-01 : f32
    %54 = vector.broadcast %cst_25 : f32 to vector<8x128xf32>
    %55 = arith.mulf %54, %53 : vector<8x128xf32>
    %cst_26 = arith.constant 5.000000e-01 : f32
    %56 = vector.broadcast %cst_26 : f32 to vector<8x128xf32>
    %57 = arith.addf %55, %56 : vector<8x128xf32>
    %58 = arith.select %5, %53, %57 : vector<8x128xi1>, vector<8x128xf32>
    %59 = vector.extract_strided_slice %58 {offsets = [0, 0], sizes = [8, 32], strides = [1, 1]} : vector<8x128xf32> to vector<8x32xf32>
    %60 = vector.extract_strided_slice %58 {offsets = [0, 32], sizes = [8, 32], strides = [1, 1]} : vector<8x128xf32> to vector<8x32xf32>
    %61 = vector.extract_strided_slice %58 {offsets = [0, 64], sizes = [8, 32], strides = [1, 1]} : vector<8x128xf32> to vector<8x32xf32>
    %62 = vector.extract_strided_slice %58 {offsets = [0, 96], sizes = [8, 32], strides = [1, 1]} : vector<8x128xf32> to vector<8x32xf32>
    %63 = arith.mulf %60, %38 : vector<8x32xf32>
    %64 = arith.mulf %59, %61 : vector<8x32xf32>
    %65 = arith.addf %63, %64 : vector<8x32xf32>
    %66 = math.tanh %65 : vector<8x32xf32>
    %67 = arith.mulf %62, %66 : vector<8x32xf32>
    %68 = arith.index_cast %c1_i32 : i32 to index
    %c0_27 = arith.constant 0 : index
    %c0_28 = arith.constant 0 : index
    %69 = vector.load %arg11[%68, %c0_27, %c0_28] : memref<8x8x32xf32, #tpu.memory_space<vmem>>, vector<1x8x32xf32>
    %70 = vector.shape_cast %69 : vector<1x8x32xf32> to vector<8x32xf32>
    %71 = vector.shape_cast %67 : vector<8x32xf32> to vector<1x8x32xf32>
    tpu.vector_store %arg11[%68, %c0_27, %c0_28], %71 {strides = array<i32>} : memref<8x8x32xf32, #tpu.memory_space<vmem>>, vector<1x8x32xf32>,
    %c2_i32 = arith.constant 2 : i32
    %72 = arith.index_cast %c2_i32 : i32 to index
    %c0_29 = arith.constant 0 : index
    %c0_30 = arith.constant 0 : index
    %73 = vector.load %arg10[%72, %c0_29, %c0_30] : memref<8x8x128xf32, #tpu.memory_space<vmem>>, vector<1x8x128xf32>
    %74 = vector.shape_cast %73 : vector<1x8x128xf32> to vector<8x128xf32>
    %cst_31 = arith.constant dense<0.000000e+00> : vector<8x128xf32>
    %75 = tpu.matmul %67, %15, %cst_31 {dimension_numbers = #tpu.dot_dimension_numbers<[1], [0], [0], [1], [0, 0, 1, 1], [], []>} : vector<8x32xf32>, vector<32x128xf32>, vector<8x128xf32> -> vector<8x128xf32>
    %76 = arith.addf %74, %75 : vector<8x128xf32>
    %cst_32 = arith.constant 5.000000e-01 : f32
    %77 = vector.broadcast %cst_32 : f32 to vector<8x128xf32>
    %78 = arith.mulf %77, %76 : vector<8x128xf32>
    %79 = arith.select %5, %76, %78 : vector<8x128xi1>, vector<8x128xf32>
    %80 = math.tanh %79 : vector<8x128xf32>
    %cst_33 = arith.constant 5.000000e-01 : f32
    %81 = vector.broadcast %cst_33 : f32 to vector<8x128xf32>
    %82 = arith.mulf %81, %80 : vector<8x128xf32>
    %cst_34 = arith.constant 5.000000e-01 : f32
    %83 = vector.broadcast %cst_34 : f32 to vector<8x128xf32>
    %84 = arith.addf %82, %83 : vector<8x128xf32>
    %85 = arith.select %5, %80, %84 : vector<8x128xi1>, vector<8x128xf32>
    %86 = vector.extract_strided_slice %85 {offsets = [0, 0], sizes = [8, 32], strides = [1, 1]} : vector<8x128xf32> to vector<8x32xf32>
    %87 = vector.extract_strided_slice %85 {offsets = [0, 32], sizes = [8, 32], strides = [1, 1]} : vector<8x128xf32> to vector<8x32xf32>
    %88 = vector.extract_strided_slice %85 {offsets = [0, 64], sizes = [8, 32], strides = [1, 1]} : vector<8x128xf32> to vector<8x32xf32>
    %89 = vector.extract_strided_slice %85 {offsets = [0, 96], sizes = [8, 32], strides = [1, 1]} : vector<8x128xf32> to vector<8x32xf32>
    %90 = arith.mulf %87, %65 : vector<8x32xf32>
    %91 = arith.mulf %86, %88 : vector<8x32xf32>
    %92 = arith.addf %90, %91 : vector<8x32xf32>
    %93 = math.tanh %92 : vector<8x32xf32>
    %94 = arith.mulf %89, %93 : vector<8x32xf32>
    %95 = arith.index_cast %c2_i32 : i32 to index
    %c0_35 = arith.constant 0 : index
    %c0_36 = arith.constant 0 : index
    %96 = vector.load %arg11[%95, %c0_35, %c0_36] : memref<8x8x32xf32, #tpu.memory_space<vmem>>, vector<1x8x32xf32>
    %97 = vector.shape_cast %96 : vector<1x8x32xf32> to vector<8x32xf32>
    %98 = vector.shape_cast %94 : vector<8x32xf32> to vector<1x8x32xf32>
    tpu.vector_store %arg11[%95, %c0_35, %c0_36], %98 {strides = array<i32>} : memref<8x8x32xf32, #tpu.memory_space<vmem>>, vector<1x8x32xf32>,
    %c3_i32 = arith.constant 3 : i32
    %99 = arith.index_cast %c3_i32 : i32 to index
    %c0_37 = arith.constant 0 : index
    %c0_38 = arith.constant 0 : index
    %100 = vector.load %arg10[%99, %c0_37, %c0_38] : memref<8x8x128xf32, #tpu.memory_space<vmem>>, vector<1x8x128xf32>
    %101 = vector.shape_cast %100 : vector<1x8x128xf32> to vector<8x128xf32>
    %cst_39 = arith.constant dense<0.000000e+00> : vector<8x128xf32>
    %102 = tpu.matmul %94, %15, %cst_39 {dimension_numbers = #tpu.dot_dimension_numbers<[1], [0], [0], [1], [0, 0, 1, 1], [], []>} : vector<8x32xf32>, vector<32x128xf32>, vector<8x128xf32> -> vector<8x128xf32>
    %103 = arith.addf %101, %102 : vector<8x128xf32>
    %cst_40 = arith.constant 5.000000e-01 : f32
    %104 = vector.broadcast %cst_40 : f32 to vector<8x128xf32>
    %105 = arith.mulf %104, %103 : vector<8x128xf32>
    %106 = arith.select %5, %103, %105 : vector<8x128xi1>, vector<8x128xf32>
    %107 = math.tanh %106 : vector<8x128xf32>
    %cst_41 = arith.constant 5.000000e-01 : f32
    %108 = vector.broadcast %cst_41 : f32 to vector<8x128xf32>
    %109 = arith.mulf %108, %107 : vector<8x128xf32>
    %cst_42 = arith.constant 5.000000e-01 : f32
    %110 = vector.broadcast %cst_42 : f32 to vector<8x128xf32>
    %111 = arith.addf %109, %110 : vector<8x128xf32>
    %112 = arith.select %5, %107, %111 : vector<8x128xi1>, vector<8x128xf32>
    %113 = vector.extract_strided_slice %112 {offsets = [0, 0], sizes = [8, 32], strides = [1, 1]} : vector<8x128xf32> to vector<8x32xf32>
    %114 = vector.extract_strided_slice %112 {offsets = [0, 32], sizes = [8, 32], strides = [1, 1]} : vector<8x128xf32> to vector<8x32xf32>
    %115 = vector.extract_strided_slice %112 {offsets = [0, 64], sizes = [8, 32], strides = [1, 1]} : vector<8x128xf32> to vector<8x32xf32>
    %116 = vector.extract_strided_slice %112 {offsets = [0, 96], sizes = [8, 32], strides = [1, 1]} : vector<8x128xf32> to vector<8x32xf32>
    %117 = arith.mulf %114, %92 : vector<8x32xf32>
    %118 = arith.mulf %113, %115 : vector<8x32xf32>
    %119 = arith.addf %117, %118 : vector<8x32xf32>
    %120 = math.tanh %119 : vector<8x32xf32>
    %121 = arith.mulf %116, %120 : vector<8x32xf32>
    %122 = arith.index_cast %c3_i32 : i32 to index
    %c0_43 = arith.constant 0 : index
    %c0_44 = arith.constant 0 : index
    %123 = vector.load %arg11[%122, %c0_43, %c0_44] : memref<8x8x32xf32, #tpu.memory_space<vmem>>, vector<1x8x32xf32>
    %124 = vector.shape_cast %123 : vector<1x8x32xf32> to vector<8x32xf32>
    %125 = vector.shape_cast %121 : vector<8x32xf32> to vector<1x8x32xf32>
    tpu.vector_store %arg11[%122, %c0_43, %c0_44], %125 {strides = array<i32>} : memref<8x8x32xf32, #tpu.memory_space<vmem>>, vector<1x8x32xf32>,
    %c4_i32 = arith.constant 4 : i32
    %126 = arith.index_cast %c4_i32 : i32 to index
    %c0_45 = arith.constant 0 : index
    %c0_46 = arith.constant 0 : index
    %127 = vector.load %arg10[%126, %c0_45, %c0_46] : memref<8x8x128xf32, #tpu.memory_space<vmem>>, vector<1x8x128xf32>
    %128 = vector.shape_cast %127 : vector<1x8x128xf32> to vector<8x128xf32>
    %cst_47 = arith.constant dense<0.000000e+00> : vector<8x128xf32>
    %129 = tpu.matmul %121, %15, %cst_47 {dimension_numbers = #tpu.dot_dimension_numbers<[1], [0], [0], [1], [0, 0, 1, 1], [], []>} : vector<8x32xf32>, vector<32x128xf32>, vector<8x128xf32> -> vector<8x128xf32>
    %130 = arith.addf %128, %129 : vector<8x128xf32>
    %cst_48 = arith.constant 5.000000e-01 : f32
    %131 = vector.broadcast %cst_48 : f32 to vector<8x128xf32>
    %132 = arith.mulf %131, %130 : vector<8x128xf32>
    %133 = arith.select %5, %130, %132 : vector<8x128xi1>, vector<8x128xf32>
    %134 = math.tanh %133 : vector<8x128xf32>
    %cst_49 = arith.constant 5.000000e-01 : f32
    %135 = vector.broadcast %cst_49 : f32 to vector<8x128xf32>
    %136 = arith.mulf %135, %134 : vector<8x128xf32>
    %cst_50 = arith.constant 5.000000e-01 : f32
    %137 = vector.broadcast %cst_50 : f32 to vector<8x128xf32>
    %138 = arith.addf %136, %137 : vector<8x128xf32>
    %139 = arith.select %5, %134, %138 : vector<8x128xi1>, vector<8x128xf32>
    %140 = vector.extract_strided_slice %139 {offsets = [0, 0], sizes = [8, 32], strides = [1, 1]} : vector<8x128xf32> to vector<8x32xf32>
    %141 = vector.extract_strided_slice %139 {offsets = [0, 32], sizes = [8, 32], strides = [1, 1]} : vector<8x128xf32> to vector<8x32xf32>
    %142 = vector.extract_strided_slice %139 {offsets = [0, 64], sizes = [8, 32], strides = [1, 1]} : vector<8x128xf32> to vector<8x32xf32>
    %143 = vector.extract_strided_slice %139 {offsets = [0, 96], sizes = [8, 32], strides = [1, 1]} : vector<8x128xf32> to vector<8x32xf32>
    %144 = arith.mulf %141, %119 : vector<8x32xf32>
    %145 = arith.mulf %140, %142 : vector<8x32xf32>
    %146 = arith.addf %144, %145 : vector<8x32xf32>
    %147 = math.tanh %146 : vector<8x32xf32>
    %148 = arith.mulf %143, %147 : vector<8x32xf32>
    %149 = arith.index_cast %c4_i32 : i32 to index
    %c0_51 = arith.constant 0 : index
    %c0_52 = arith.constant 0 : index
    %150 = vector.load %arg11[%149, %c0_51, %c0_52] : memref<8x8x32xf32, #tpu.memory_space<vmem>>, vector<1x8x32xf32>
    %151 = vector.shape_cast %150 : vector<1x8x32xf32> to vector<8x32xf32>
    %152 = vector.shape_cast %148 : vector<8x32xf32> to vector<1x8x32xf32>
    tpu.vector_store %arg11[%149, %c0_51, %c0_52], %152 {strides = array<i32>} : memref<8x8x32xf32, #tpu.memory_space<vmem>>, vector<1x8x32xf32>,
    %c5_i32 = arith.constant 5 : i32
    %153 = arith.index_cast %c5_i32 : i32 to index
    %c0_53 = arith.constant 0 : index
    %c0_54 = arith.constant 0 : index
    %154 = vector.load %arg10[%153, %c0_53, %c0_54] : memref<8x8x128xf32, #tpu.memory_space<vmem>>, vector<1x8x128xf32>
    %155 = vector.shape_cast %154 : vector<1x8x128xf32> to vector<8x128xf32>
    %cst_55 = arith.constant dense<0.000000e+00> : vector<8x128xf32>
    %156 = tpu.matmul %148, %15, %cst_55 {dimension_numbers = #tpu.dot_dimension_numbers<[1], [0], [0], [1], [0, 0, 1, 1], [], []>} : vector<8x32xf32>, vector<32x128xf32>, vector<8x128xf32> -> vector<8x128xf32>
    %157 = arith.addf %155, %156 : vector<8x128xf32>
    %cst_56 = arith.constant 5.000000e-01 : f32
    %158 = vector.broadcast %cst_56 : f32 to vector<8x128xf32>
    %159 = arith.mulf %158, %157 : vector<8x128xf32>
    %160 = arith.select %5, %157, %159 : vector<8x128xi1>, vector<8x128xf32>
    %161 = math.tanh %160 : vector<8x128xf32>
    %cst_57 = arith.constant 5.000000e-01 : f32
    %162 = vector.broadcast %cst_57 : f32 to vector<8x128xf32>
    %163 = arith.mulf %162, %161 : vector<8x128xf32>
    %cst_58 = arith.constant 5.000000e-01 : f32
    %164 = vector.broadcast %cst_58 : f32 to vector<8x128xf32>
    %165 = arith.addf %163, %164 : vector<8x128xf32>
    %166 = arith.select %5, %161, %165 : vector<8x128xi1>, vector<8x128xf32>
    %167 = vector.extract_strided_slice %166 {offsets = [0, 0], sizes = [8, 32], strides = [1, 1]} : vector<8x128xf32> to vector<8x32xf32>
    %168 = vector.extract_strided_slice %166 {offsets = [0, 32], sizes = [8, 32], strides = [1, 1]} : vector<8x128xf32> to vector<8x32xf32>
    %169 = vector.extract_strided_slice %166 {offsets = [0, 64], sizes = [8, 32], strides = [1, 1]} : vector<8x128xf32> to vector<8x32xf32>
    %170 = vector.extract_strided_slice %166 {offsets = [0, 96], sizes = [8, 32], strides = [1, 1]} : vector<8x128xf32> to vector<8x32xf32>
    %171 = arith.mulf %168, %146 : vector<8x32xf32>
    %172 = arith.mulf %167, %169 : vector<8x32xf32>
    %173 = arith.addf %171, %172 : vector<8x32xf32>
    %174 = math.tanh %173 : vector<8x32xf32>
    %175 = arith.mulf %170, %174 : vector<8x32xf32>
    %176 = arith.index_cast %c5_i32 : i32 to index
    %c0_59 = arith.constant 0 : index
    %c0_60 = arith.constant 0 : index
    %177 = vector.load %arg11[%176, %c0_59, %c0_60] : memref<8x8x32xf32, #tpu.memory_space<vmem>>, vector<1x8x32xf32>
    %178 = vector.shape_cast %177 : vector<1x8x32xf32> to vector<8x32xf32>
    %179 = vector.shape_cast %175 : vector<8x32xf32> to vector<1x8x32xf32>
    tpu.vector_store %arg11[%176, %c0_59, %c0_60], %179 {strides = array<i32>} : memref<8x8x32xf32, #tpu.memory_space<vmem>>, vector<1x8x32xf32>,
    %c6_i32 = arith.constant 6 : i32
    %180 = arith.index_cast %c6_i32 : i32 to index
    %c0_61 = arith.constant 0 : index
    %c0_62 = arith.constant 0 : index
    %181 = vector.load %arg10[%180, %c0_61, %c0_62] : memref<8x8x128xf32, #tpu.memory_space<vmem>>, vector<1x8x128xf32>
    %182 = vector.shape_cast %181 : vector<1x8x128xf32> to vector<8x128xf32>
    %cst_63 = arith.constant dense<0.000000e+00> : vector<8x128xf32>
    %183 = tpu.matmul %175, %15, %cst_63 {dimension_numbers = #tpu.dot_dimension_numbers<[1], [0], [0], [1], [0, 0, 1, 1], [], []>} : vector<8x32xf32>, vector<32x128xf32>, vector<8x128xf32> -> vector<8x128xf32>
    %184 = arith.addf %182, %183 : vector<8x128xf32>
    %cst_64 = arith.constant 5.000000e-01 : f32
    %185 = vector.broadcast %cst_64 : f32 to vector<8x128xf32>
    %186 = arith.mulf %185, %184 : vector<8x128xf32>
    %187 = arith.select %5, %184, %186 : vector<8x128xi1>, vector<8x128xf32>
    %188 = math.tanh %187 : vector<8x128xf32>
    %cst_65 = arith.constant 5.000000e-01 : f32
    %189 = vector.broadcast %cst_65 : f32 to vector<8x128xf32>
    %190 = arith.mulf %189, %188 : vector<8x128xf32>
    %cst_66 = arith.constant 5.000000e-01 : f32
    %191 = vector.broadcast %cst_66 : f32 to vector<8x128xf32>
    %192 = arith.addf %190, %191 : vector<8x128xf32>
    %193 = arith.select %5, %188, %192 : vector<8x128xi1>, vector<8x128xf32>
    %194 = vector.extract_strided_slice %193 {offsets = [0, 0], sizes = [8, 32], strides = [1, 1]} : vector<8x128xf32> to vector<8x32xf32>
    %195 = vector.extract_strided_slice %193 {offsets = [0, 32], sizes = [8, 32], strides = [1, 1]} : vector<8x128xf32> to vector<8x32xf32>
    %196 = vector.extract_strided_slice %193 {offsets = [0, 64], sizes = [8, 32], strides = [1, 1]} : vector<8x128xf32> to vector<8x32xf32>
    %197 = vector.extract_strided_slice %193 {offsets = [0, 96], sizes = [8, 32], strides = [1, 1]} : vector<8x128xf32> to vector<8x32xf32>
    %198 = arith.mulf %195, %173 : vector<8x32xf32>
    %199 = arith.mulf %194, %196 : vector<8x32xf32>
    %200 = arith.addf %198, %199 : vector<8x32xf32>
    %201 = math.tanh %200 : vector<8x32xf32>
    %202 = arith.mulf %197, %201 : vector<8x32xf32>
    %203 = arith.index_cast %c6_i32 : i32 to index
    %c0_67 = arith.constant 0 : index
    %c0_68 = arith.constant 0 : index
    %204 = vector.load %arg11[%203, %c0_67, %c0_68] : memref<8x8x32xf32, #tpu.memory_space<vmem>>, vector<1x8x32xf32>
    %205 = vector.shape_cast %204 : vector<1x8x32xf32> to vector<8x32xf32>
    %206 = vector.shape_cast %202 : vector<8x32xf32> to vector<1x8x32xf32>
    tpu.vector_store %arg11[%203, %c0_67, %c0_68], %206 {strides = array<i32>} : memref<8x8x32xf32, #tpu.memory_space<vmem>>, vector<1x8x32xf32>,
    %c7_i32 = arith.constant 7 : i32
    %207 = arith.index_cast %c7_i32 : i32 to index
    %c0_69 = arith.constant 0 : index
    %c0_70 = arith.constant 0 : index
    %208 = vector.load %arg10[%207, %c0_69, %c0_70] : memref<8x8x128xf32, #tpu.memory_space<vmem>>, vector<1x8x128xf32>
    %209 = vector.shape_cast %208 : vector<1x8x128xf32> to vector<8x128xf32>
    %cst_71 = arith.constant dense<0.000000e+00> : vector<8x128xf32>
    %210 = tpu.matmul %202, %15, %cst_71 {dimension_numbers = #tpu.dot_dimension_numbers<[1], [0], [0], [1], [0, 0, 1, 1], [], []>} : vector<8x32xf32>, vector<32x128xf32>, vector<8x128xf32> -> vector<8x128xf32>
    %211 = arith.addf %209, %210 : vector<8x128xf32>
    %cst_72 = arith.constant 5.000000e-01 : f32
    %212 = vector.broadcast %cst_72 : f32 to vector<8x128xf32>
    %213 = arith.mulf %212, %211 : vector<8x128xf32>
    %214 = arith.select %5, %211, %213 : vector<8x128xi1>, vector<8x128xf32>
    %215 = math.tanh %214 : vector<8x128xf32>
    %cst_73 = arith.constant 5.000000e-01 : f32
    %216 = vector.broadcast %cst_73 : f32 to vector<8x128xf32>
    %217 = arith.mulf %216, %215 : vector<8x128xf32>
    %cst_74 = arith.constant 5.000000e-01 : f32
    %218 = vector.broadcast %cst_74 : f32 to vector<8x128xf32>
    %219 = arith.addf %217, %218 : vector<8x128xf32>
    %220 = arith.select %5, %215, %219 : vector<8x128xi1>, vector<8x128xf32>
    %221 = vector.extract_strided_slice %220 {offsets = [0, 0], sizes = [8, 32], strides = [1, 1]} : vector<8x128xf32> to vector<8x32xf32>
    %222 = vector.extract_strided_slice %220 {offsets = [0, 32], sizes = [8, 32], strides = [1, 1]} : vector<8x128xf32> to vector<8x32xf32>
    %223 = vector.extract_strided_slice %220 {offsets = [0, 64], sizes = [8, 32], strides = [1, 1]} : vector<8x128xf32> to vector<8x32xf32>
    %224 = vector.extract_strided_slice %220 {offsets = [0, 96], sizes = [8, 32], strides = [1, 1]} : vector<8x128xf32> to vector<8x32xf32>
    %225 = arith.mulf %222, %200 : vector<8x32xf32>
    %226 = arith.mulf %221, %223 : vector<8x32xf32>
    %227 = arith.addf %225, %226 : vector<8x32xf32>
    %228 = math.tanh %227 : vector<8x32xf32>
    %229 = arith.mulf %224, %228 : vector<8x32xf32>
    %230 = arith.index_cast %c7_i32 : i32 to index
    %c0_75 = arith.constant 0 : index
    %c0_76 = arith.constant 0 : index
    %231 = vector.load %arg11[%230, %c0_75, %c0_76] : memref<8x8x32xf32, #tpu.memory_space<vmem>>, vector<1x8x32xf32>
    %232 = vector.shape_cast %231 : vector<1x8x32xf32> to vector<8x32xf32>
    %233 = vector.shape_cast %229 : vector<8x32xf32> to vector<1x8x32xf32>
    tpu.vector_store %arg11[%230, %c0_75, %c0_76], %233 {strides = array<i32>} : memref<8x8x32xf32, #tpu.memory_space<vmem>>, vector<1x8x32xf32>,
    %c8_i32 = arith.constant 8 : i32
    %c0_77 = arith.constant 0 : index
    %c0_78 = arith.constant 0 : index
    %c0_79 = arith.constant 0 : index
    %234 = vector.load %arg11[%c0_77, %c0_78, %c0_79] : memref<8x8x32xf32, #tpu.memory_space<vmem>>, vector<8x8x32xf32>
    %235 = vector.shape_cast %234 : vector<8x8x32xf32> to vector<64x32xf32>
    %c0_80 = arith.constant 0 : index
    %c0_81 = arith.constant 0 : index
    %236 = vector.load %arg4[%c0_80, %c0_81] : memref<32x128xf32, #tpu.memory_space<vmem>>, vector<32x128xf32>
    %cst_82 = arith.constant dense<0.000000e+00> : vector<64x128xf32>
    %237 = tpu.matmul %235, %236, %cst_82 {dimension_numbers = #tpu.dot_dimension_numbers<[1], [0], [0], [1], [0, 0, 1, 1], [], []>} : vector<64x32xf32>, vector<32x128xf32>, vector<64x128xf32> -> vector<64x128xf32>
    %c0_83 = arith.constant 0 : index
    %c0_84 = arith.constant 0 : index
    %238 = vector.load %arg6[%c0_83, %c0_84] : memref<1x128xf32, #tpu.memory_space<vmem>>, vector<1x128xf32>
    %239 = vector.broadcast %238 : vector<1x128xf32> to vector<64x128xf32>
    %240 = arith.addf %237, %239 : vector<64x128xf32>
    %241 = vector.shape_cast %240 : vector<64x128xf32> to vector<8x8x128xf32>
    %c0_85 = arith.constant 0 : index
    %c0_86 = arith.constant 0 : index
    %c0_87 = arith.constant 0 : index
    %242 = vector.load %arg10[%c0_85, %c0_86, %c0_87] : memref<8x8x128xf32, #tpu.memory_space<vmem>>, vector<8x8x128xf32>
    tpu.vector_store %arg10[%c0_85, %c0_86, %c0_87], %241 {strides = array<i32>} : memref<8x8x128xf32, #tpu.memory_space<vmem>>, vector<8x8x128xf32>,
    %c0_88 = arith.constant 0 : index
    %c0_89 = arith.constant 0 : index
    %243 = vector.load %arg5[%c0_88, %c0_89] : memref<32x128xf32, #tpu.memory_space<vmem>>, vector<32x128xf32>
    %cst_90 = arith.constant 0.000000e+00 : f32
    %244 = vector.broadcast %cst_90 : f32 to vector<8x32xf32>
    %cst_91 = arith.constant 0.000000e+00 : f32
    %245 = vector.broadcast %cst_91 : f32 to vector<8x32xf32>
    %c0_i32_92 = arith.constant 0 : i32
    %246 = arith.index_cast %c0_i32_92 : i32 to index
    %c0_93 = arith.constant 0 : index
    %c0_94 = arith.constant 0 : index
    %247 = vector.load %arg10[%246, %c0_93, %c0_94] : memref<8x8x128xf32, #tpu.memory_space<vmem>>, vector<1x8x128xf32>
    %248 = vector.shape_cast %247 : vector<1x8x128xf32> to vector<8x128xf32>
    %cst_95 = arith.constant dense<0.000000e+00> : vector<8x128xf32>
    %249 = tpu.matmul %244, %243, %cst_95 {dimension_numbers = #tpu.dot_dimension_numbers<[1], [0], [0], [1], [0, 0, 1, 1], [], []>} : vector<8x32xf32>, vector<32x128xf32>, vector<8x128xf32> -> vector<8x128xf32>
    %250 = arith.addf %248, %249 : vector<8x128xf32>
    %cst_96 = arith.constant 5.000000e-01 : f32
    %251 = vector.broadcast %cst_96 : f32 to vector<8x128xf32>
    %252 = arith.mulf %251, %250 : vector<8x128xf32>
    %253 = arith.select %5, %250, %252 : vector<8x128xi1>, vector<8x128xf32>
    %254 = math.tanh %253 : vector<8x128xf32>
    %cst_97 = arith.constant 5.000000e-01 : f32
    %255 = vector.broadcast %cst_97 : f32 to vector<8x128xf32>
    %256 = arith.mulf %255, %254 : vector<8x128xf32>
    %cst_98 = arith.constant 5.000000e-01 : f32
    %257 = vector.broadcast %cst_98 : f32 to vector<8x128xf32>
    %258 = arith.addf %256, %257 : vector<8x128xf32>
    %259 = arith.select %5, %254, %258 : vector<8x128xi1>, vector<8x128xf32>
    %260 = vector.extract_strided_slice %259 {offsets = [0, 0], sizes = [8, 32], strides = [1, 1]} : vector<8x128xf32> to vector<8x32xf32>
    %261 = vector.extract_strided_slice %259 {offsets = [0, 32], sizes = [8, 32], strides = [1, 1]} : vector<8x128xf32> to vector<8x32xf32>
    %262 = vector.extract_strided_slice %259 {offsets = [0, 64], sizes = [8, 32], strides = [1, 1]} : vector<8x128xf32> to vector<8x32xf32>
    %263 = vector.extract_strided_slice %259 {offsets = [0, 96], sizes = [8, 32], strides = [1, 1]} : vector<8x128xf32> to vector<8x32xf32>
    %264 = arith.mulf %261, %245 : vector<8x32xf32>
    %265 = arith.mulf %260, %262 : vector<8x32xf32>
    %266 = arith.addf %264, %265 : vector<8x32xf32>
    %267 = math.tanh %266 : vector<8x32xf32>
    %268 = arith.mulf %263, %267 : vector<8x32xf32>
    %c1_i32_99 = arith.constant 1 : i32
    %269 = arith.index_cast %c1_i32_99 : i32 to index
    %c0_100 = arith.constant 0 : index
    %c0_101 = arith.constant 0 : index
    %270 = vector.load %arg10[%269, %c0_100, %c0_101] : memref<8x8x128xf32, #tpu.memory_space<vmem>>, vector<1x8x128xf32>
    %271 = vector.shape_cast %270 : vector<1x8x128xf32> to vector<8x128xf32>
    %cst_102 = arith.constant dense<0.000000e+00> : vector<8x128xf32>
    %272 = tpu.matmul %268, %243, %cst_102 {dimension_numbers = #tpu.dot_dimension_numbers<[1], [0], [0], [1], [0, 0, 1, 1], [], []>} : vector<8x32xf32>, vector<32x128xf32>, vector<8x128xf32> -> vector<8x128xf32>
    %273 = arith.addf %271, %272 : vector<8x128xf32>
    %cst_103 = arith.constant 5.000000e-01 : f32
    %274 = vector.broadcast %cst_103 : f32 to vector<8x128xf32>
    %275 = arith.mulf %274, %273 : vector<8x128xf32>
    %276 = arith.select %5, %273, %275 : vector<8x128xi1>, vector<8x128xf32>
    %277 = math.tanh %276 : vector<8x128xf32>
    %cst_104 = arith.constant 5.000000e-01 : f32
    %278 = vector.broadcast %cst_104 : f32 to vector<8x128xf32>
    %279 = arith.mulf %278, %277 : vector<8x128xf32>
    %cst_105 = arith.constant 5.000000e-01 : f32
    %280 = vector.broadcast %cst_105 : f32 to vector<8x128xf32>
    %281 = arith.addf %279, %280 : vector<8x128xf32>
    %282 = arith.select %5, %277, %281 : vector<8x128xi1>, vector<8x128xf32>
    %283 = vector.extract_strided_slice %282 {offsets = [0, 0], sizes = [8, 32], strides = [1, 1]} : vector<8x128xf32> to vector<8x32xf32>
    %284 = vector.extract_strided_slice %282 {offsets = [0, 32], sizes = [8, 32], strides = [1, 1]} : vector<8x128xf32> to vector<8x32xf32>
    %285 = vector.extract_strided_slice %282 {offsets = [0, 64], sizes = [8, 32], strides = [1, 1]} : vector<8x128xf32> to vector<8x32xf32>
    %286 = vector.extract_strided_slice %282 {offsets = [0, 96], sizes = [8, 32], strides = [1, 1]} : vector<8x128xf32> to vector<8x32xf32>
    %287 = arith.mulf %284, %266 : vector<8x32xf32>
    %288 = arith.mulf %283, %285 : vector<8x32xf32>
    %289 = arith.addf %287, %288 : vector<8x32xf32>
    %290 = math.tanh %289 : vector<8x32xf32>
    %291 = arith.mulf %286, %290 : vector<8x32xf32>
    %c2_i32_106 = arith.constant 2 : i32
    %292 = arith.index_cast %c2_i32_106 : i32 to index
    %c0_107 = arith.constant 0 : index
    %c0_108 = arith.constant 0 : index
    %293 = vector.load %arg10[%292, %c0_107, %c0_108] : memref<8x8x128xf32, #tpu.memory_space<vmem>>, vector<1x8x128xf32>
    %294 = vector.shape_cast %293 : vector<1x8x128xf32> to vector<8x128xf32>
    %cst_109 = arith.constant dense<0.000000e+00> : vector<8x128xf32>
    %295 = tpu.matmul %291, %243, %cst_109 {dimension_numbers = #tpu.dot_dimension_numbers<[1], [0], [0], [1], [0, 0, 1, 1], [], []>} : vector<8x32xf32>, vector<32x128xf32>, vector<8x128xf32> -> vector<8x128xf32>
    %296 = arith.addf %294, %295 : vector<8x128xf32>
    %cst_110 = arith.constant 5.000000e-01 : f32
    %297 = vector.broadcast %cst_110 : f32 to vector<8x128xf32>
    %298 = arith.mulf %297, %296 : vector<8x128xf32>
    %299 = arith.select %5, %296, %298 : vector<8x128xi1>, vector<8x128xf32>
    %300 = math.tanh %299 : vector<8x128xf32>
    %cst_111 = arith.constant 5.000000e-01 : f32
    %301 = vector.broadcast %cst_111 : f32 to vector<8x128xf32>
    %302 = arith.mulf %301, %300 : vector<8x128xf32>
    %cst_112 = arith.constant 5.000000e-01 : f32
    %303 = vector.broadcast %cst_112 : f32 to vector<8x128xf32>
    %304 = arith.addf %302, %303 : vector<8x128xf32>
    %305 = arith.select %5, %300, %304 : vector<8x128xi1>, vector<8x128xf32>
    %306 = vector.extract_strided_slice %305 {offsets = [0, 0], sizes = [8, 32], strides = [1, 1]} : vector<8x128xf32> to vector<8x32xf32>
    %307 = vector.extract_strided_slice %305 {offsets = [0, 32], sizes = [8, 32], strides = [1, 1]} : vector<8x128xf32> to vector<8x32xf32>
    %308 = vector.extract_strided_slice %305 {offsets = [0, 64], sizes = [8, 32], strides = [1, 1]} : vector<8x128xf32> to vector<8x32xf32>
    %309 = vector.extract_strided_slice %305 {offsets = [0, 96], sizes = [8, 32], strides = [1, 1]} : vector<8x128xf32> to vector<8x32xf32>
    %310 = arith.mulf %307, %289 : vector<8x32xf32>
    %311 = arith.mulf %306, %308 : vector<8x32xf32>
    %312 = arith.addf %310, %311 : vector<8x32xf32>
    %313 = math.tanh %312 : vector<8x32xf32>
    %314 = arith.mulf %309, %313 : vector<8x32xf32>
    %c3_i32_113 = arith.constant 3 : i32
    %315 = arith.index_cast %c3_i32_113 : i32 to index
    %c0_114 = arith.constant 0 : index
    %c0_115 = arith.constant 0 : index
    %316 = vector.load %arg10[%315, %c0_114, %c0_115] : memref<8x8x128xf32, #tpu.memory_space<vmem>>, vector<1x8x128xf32>
    %317 = vector.shape_cast %316 : vector<1x8x128xf32> to vector<8x128xf32>
    %cst_116 = arith.constant dense<0.000000e+00> : vector<8x128xf32>
    %318 = tpu.matmul %314, %243, %cst_116 {dimension_numbers = #tpu.dot_dimension_numbers<[1], [0], [0], [1], [0, 0, 1, 1], [], []>} : vector<8x32xf32>, vector<32x128xf32>, vector<8x128xf32> -> vector<8x128xf32>
    %319 = arith.addf %317, %318 : vector<8x128xf32>
    %cst_117 = arith.constant 5.000000e-01 : f32
    %320 = vector.broadcast %cst_117 : f32 to vector<8x128xf32>
    %321 = arith.mulf %320, %319 : vector<8x128xf32>
    %322 = arith.select %5, %319, %321 : vector<8x128xi1>, vector<8x128xf32>
    %323 = math.tanh %322 : vector<8x128xf32>
    %cst_118 = arith.constant 5.000000e-01 : f32
    %324 = vector.broadcast %cst_118 : f32 to vector<8x128xf32>
    %325 = arith.mulf %324, %323 : vector<8x128xf32>
    %cst_119 = arith.constant 5.000000e-01 : f32
    %326 = vector.broadcast %cst_119 : f32 to vector<8x128xf32>
    %327 = arith.addf %325, %326 : vector<8x128xf32>
    %328 = arith.select %5, %323, %327 : vector<8x128xi1>, vector<8x128xf32>
    %329 = vector.extract_strided_slice %328 {offsets = [0, 0], sizes = [8, 32], strides = [1, 1]} : vector<8x128xf32> to vector<8x32xf32>
    %330 = vector.extract_strided_slice %328 {offsets = [0, 32], sizes = [8, 32], strides = [1, 1]} : vector<8x128xf32> to vector<8x32xf32>
    %331 = vector.extract_strided_slice %328 {offsets = [0, 64], sizes = [8, 32], strides = [1, 1]} : vector<8x128xf32> to vector<8x32xf32>
    %332 = vector.extract_strided_slice %328 {offsets = [0, 96], sizes = [8, 32], strides = [1, 1]} : vector<8x128xf32> to vector<8x32xf32>
    %333 = arith.mulf %330, %312 : vector<8x32xf32>
    %334 = arith.mulf %329, %331 : vector<8x32xf32>
    %335 = arith.addf %333, %334 : vector<8x32xf32>
    %336 = math.tanh %335 : vector<8x32xf32>
    %337 = arith.mulf %332, %336 : vector<8x32xf32>
    %c4_i32_120 = arith.constant 4 : i32
    %338 = arith.index_cast %c4_i32_120 : i32 to index
    %c0_121 = arith.constant 0 : index
    %c0_122 = arith.constant 0 : index
    %339 = vector.load %arg10[%338, %c0_121, %c0_122] : memref<8x8x128xf32, #tpu.memory_space<vmem>>, vector<1x8x128xf32>
    %340 = vector.shape_cast %339 : vector<1x8x128xf32> to vector<8x128xf32>
    %cst_123 = arith.constant dense<0.000000e+00> : vector<8x128xf32>
    %341 = tpu.matmul %337, %243, %cst_123 {dimension_numbers = #tpu.dot_dimension_numbers<[1], [0], [0], [1], [0, 0, 1, 1], [], []>} : vector<8x32xf32>, vector<32x128xf32>, vector<8x128xf32> -> vector<8x128xf32>
    %342 = arith.addf %340, %341 : vector<8x128xf32>
    %cst_124 = arith.constant 5.000000e-01 : f32
    %343 = vector.broadcast %cst_124 : f32 to vector<8x128xf32>
    %344 = arith.mulf %343, %342 : vector<8x128xf32>
    %345 = arith.select %5, %342, %344 : vector<8x128xi1>, vector<8x128xf32>
    %346 = math.tanh %345 : vector<8x128xf32>
    %cst_125 = arith.constant 5.000000e-01 : f32
    %347 = vector.broadcast %cst_125 : f32 to vector<8x128xf32>
    %348 = arith.mulf %347, %346 : vector<8x128xf32>
    %cst_126 = arith.constant 5.000000e-01 : f32
    %349 = vector.broadcast %cst_126 : f32 to vector<8x128xf32>
    %350 = arith.addf %348, %349 : vector<8x128xf32>
    %351 = arith.select %5, %346, %350 : vector<8x128xi1>, vector<8x128xf32>
    %352 = vector.extract_strided_slice %351 {offsets = [0, 0], sizes = [8, 32], strides = [1, 1]} : vector<8x128xf32> to vector<8x32xf32>
    %353 = vector.extract_strided_slice %351 {offsets = [0, 32], sizes = [8, 32], strides = [1, 1]} : vector<8x128xf32> to vector<8x32xf32>
    %354 = vector.extract_strided_slice %351 {offsets = [0, 64], sizes = [8, 32], strides = [1, 1]} : vector<8x128xf32> to vector<8x32xf32>
    %355 = vector.extract_strided_slice %351 {offsets = [0, 96], sizes = [8, 32], strides = [1, 1]} : vector<8x128xf32> to vector<8x32xf32>
    %356 = arith.mulf %353, %335 : vector<8x32xf32>
    %357 = arith.mulf %352, %354 : vector<8x32xf32>
    %358 = arith.addf %356, %357 : vector<8x32xf32>
    %359 = math.tanh %358 : vector<8x32xf32>
    %360 = arith.mulf %355, %359 : vector<8x32xf32>
    %c5_i32_127 = arith.constant 5 : i32
    %361 = arith.index_cast %c5_i32_127 : i32 to index
    %c0_128 = arith.constant 0 : index
    %c0_129 = arith.constant 0 : index
    %362 = vector.load %arg10[%361, %c0_128, %c0_129] : memref<8x8x128xf32, #tpu.memory_space<vmem>>, vector<1x8x128xf32>
    %363 = vector.shape_cast %362 : vector<1x8x128xf32> to vector<8x128xf32>
    %cst_130 = arith.constant dense<0.000000e+00> : vector<8x128xf32>
    %364 = tpu.matmul %360, %243, %cst_130 {dimension_numbers = #tpu.dot_dimension_numbers<[1], [0], [0], [1], [0, 0, 1, 1], [], []>} : vector<8x32xf32>, vector<32x128xf32>, vector<8x128xf32> -> vector<8x128xf32>
    %365 = arith.addf %363, %364 : vector<8x128xf32>
    %cst_131 = arith.constant 5.000000e-01 : f32
    %366 = vector.broadcast %cst_131 : f32 to vector<8x128xf32>
    %367 = arith.mulf %366, %365 : vector<8x128xf32>
    %368 = arith.select %5, %365, %367 : vector<8x128xi1>, vector<8x128xf32>
    %369 = math.tanh %368 : vector<8x128xf32>
    %cst_132 = arith.constant 5.000000e-01 : f32
    %370 = vector.broadcast %cst_132 : f32 to vector<8x128xf32>
    %371 = arith.mulf %370, %369 : vector<8x128xf32>
    %cst_133 = arith.constant 5.000000e-01 : f32
    %372 = vector.broadcast %cst_133 : f32 to vector<8x128xf32>
    %373 = arith.addf %371, %372 : vector<8x128xf32>
    %374 = arith.select %5, %369, %373 : vector<8x128xi1>, vector<8x128xf32>
    %375 = vector.extract_strided_slice %374 {offsets = [0, 0], sizes = [8, 32], strides = [1, 1]} : vector<8x128xf32> to vector<8x32xf32>
    %376 = vector.extract_strided_slice %374 {offsets = [0, 32], sizes = [8, 32], strides = [1, 1]} : vector<8x128xf32> to vector<8x32xf32>
    %377 = vector.extract_strided_slice %374 {offsets = [0, 64], sizes = [8, 32], strides = [1, 1]} : vector<8x128xf32> to vector<8x32xf32>
    %378 = vector.extract_strided_slice %374 {offsets = [0, 96], sizes = [8, 32], strides = [1, 1]} : vector<8x128xf32> to vector<8x32xf32>
    %379 = arith.mulf %376, %358 : vector<8x32xf32>
    %380 = arith.mulf %375, %377 : vector<8x32xf32>
    %381 = arith.addf %379, %380 : vector<8x32xf32>
    %382 = math.tanh %381 : vector<8x32xf32>
    %383 = arith.mulf %378, %382 : vector<8x32xf32>
    %c6_i32_134 = arith.constant 6 : i32
    %384 = arith.index_cast %c6_i32_134 : i32 to index
    %c0_135 = arith.constant 0 : index
    %c0_136 = arith.constant 0 : index
    %385 = vector.load %arg10[%384, %c0_135, %c0_136] : memref<8x8x128xf32, #tpu.memory_space<vmem>>, vector<1x8x128xf32>
    %386 = vector.shape_cast %385 : vector<1x8x128xf32> to vector<8x128xf32>
    %cst_137 = arith.constant dense<0.000000e+00> : vector<8x128xf32>
    %387 = tpu.matmul %383, %243, %cst_137 {dimension_numbers = #tpu.dot_dimension_numbers<[1], [0], [0], [1], [0, 0, 1, 1], [], []>} : vector<8x32xf32>, vector<32x128xf32>, vector<8x128xf32> -> vector<8x128xf32>
    %388 = arith.addf %386, %387 : vector<8x128xf32>
    %cst_138 = arith.constant 5.000000e-01 : f32
    %389 = vector.broadcast %cst_138 : f32 to vector<8x128xf32>
    %390 = arith.mulf %389, %388 : vector<8x128xf32>
    %391 = arith.select %5, %388, %390 : vector<8x128xi1>, vector<8x128xf32>
    %392 = math.tanh %391 : vector<8x128xf32>
    %cst_139 = arith.constant 5.000000e-01 : f32
    %393 = vector.broadcast %cst_139 : f32 to vector<8x128xf32>
    %394 = arith.mulf %393, %392 : vector<8x128xf32>
    %cst_140 = arith.constant 5.000000e-01 : f32
    %395 = vector.broadcast %cst_140 : f32 to vector<8x128xf32>
    %396 = arith.addf %394, %395 : vector<8x128xf32>
    %397 = arith.select %5, %392, %396 : vector<8x128xi1>, vector<8x128xf32>
    %398 = vector.extract_strided_slice %397 {offsets = [0, 0], sizes = [8, 32], strides = [1, 1]} : vector<8x128xf32> to vector<8x32xf32>
    %399 = vector.extract_strided_slice %397 {offsets = [0, 32], sizes = [8, 32], strides = [1, 1]} : vector<8x128xf32> to vector<8x32xf32>
    %400 = vector.extract_strided_slice %397 {offsets = [0, 64], sizes = [8, 32], strides = [1, 1]} : vector<8x128xf32> to vector<8x32xf32>
    %401 = vector.extract_strided_slice %397 {offsets = [0, 96], sizes = [8, 32], strides = [1, 1]} : vector<8x128xf32> to vector<8x32xf32>
    %402 = arith.mulf %399, %381 : vector<8x32xf32>
    %403 = arith.mulf %398, %400 : vector<8x32xf32>
    %404 = arith.addf %402, %403 : vector<8x32xf32>
    %405 = math.tanh %404 : vector<8x32xf32>
    %406 = arith.mulf %401, %405 : vector<8x32xf32>
    %c7_i32_141 = arith.constant 7 : i32
    %407 = arith.index_cast %c7_i32_141 : i32 to index
    %c0_142 = arith.constant 0 : index
    %c0_143 = arith.constant 0 : index
    %408 = vector.load %arg10[%407, %c0_142, %c0_143] : memref<8x8x128xf32, #tpu.memory_space<vmem>>, vector<1x8x128xf32>
    %409 = vector.shape_cast %408 : vector<1x8x128xf32> to vector<8x128xf32>
    %cst_144 = arith.constant dense<0.000000e+00> : vector<8x128xf32>
    %410 = tpu.matmul %406, %243, %cst_144 {dimension_numbers = #tpu.dot_dimension_numbers<[1], [0], [0], [1], [0, 0, 1, 1], [], []>} : vector<8x32xf32>, vector<32x128xf32>, vector<8x128xf32> -> vector<8x128xf32>
    %411 = arith.addf %409, %410 : vector<8x128xf32>
    %cst_145 = arith.constant 5.000000e-01 : f32
    %412 = vector.broadcast %cst_145 : f32 to vector<8x128xf32>
    %413 = arith.mulf %412, %411 : vector<8x128xf32>
    %414 = arith.select %5, %411, %413 : vector<8x128xi1>, vector<8x128xf32>
    %415 = math.tanh %414 : vector<8x128xf32>
    %cst_146 = arith.constant 5.000000e-01 : f32
    %416 = vector.broadcast %cst_146 : f32 to vector<8x128xf32>
    %417 = arith.mulf %416, %415 : vector<8x128xf32>
    %cst_147 = arith.constant 5.000000e-01 : f32
    %418 = vector.broadcast %cst_147 : f32 to vector<8x128xf32>
    %419 = arith.addf %417, %418 : vector<8x128xf32>
    %420 = arith.select %5, %415, %419 : vector<8x128xi1>, vector<8x128xf32>
    %421 = vector.extract_strided_slice %420 {offsets = [0, 0], sizes = [8, 32], strides = [1, 1]} : vector<8x128xf32> to vector<8x32xf32>
    %422 = vector.extract_strided_slice %420 {offsets = [0, 32], sizes = [8, 32], strides = [1, 1]} : vector<8x128xf32> to vector<8x32xf32>
    %423 = vector.extract_strided_slice %420 {offsets = [0, 64], sizes = [8, 32], strides = [1, 1]} : vector<8x128xf32> to vector<8x32xf32>
    %424 = vector.extract_strided_slice %420 {offsets = [0, 96], sizes = [8, 32], strides = [1, 1]} : vector<8x128xf32> to vector<8x32xf32>
    %425 = arith.mulf %422, %404 : vector<8x32xf32>
    %426 = arith.mulf %421, %423 : vector<8x32xf32>
    %427 = arith.addf %425, %426 : vector<8x32xf32>
    %428 = math.tanh %427 : vector<8x32xf32>
    %429 = arith.mulf %424, %428 : vector<8x32xf32>
    %c8_i32_148 = arith.constant 8 : i32
    %c0_149 = arith.constant 0 : index
    %c0_150 = arith.constant 0 : index
    %430 = vector.load %arg7[%c0_149, %c0_150] : memref<1x32xf32, #tpu.memory_space<vmem>>, vector<1x32xf32>
    %431 = vector.broadcast %430 : vector<1x32xf32> to vector<8x32xf32>
    %432 = arith.mulf %429, %431 : vector<8x32xf32>
    %cst_151 = arith.constant dense<0.000000e+00> : vector<8xf32>
    %433 = vector.multi_reduction <add>, %432, %cst_151 [1] : vector<8x32xf32> to vector<8xf32>
    %434 = vector.shape_cast %433 : vector<8xf32> to vector<8x1xf32>
    %c0_152 = arith.constant 0 : index
    %c0_153 = arith.constant 0 : index
    %435 = vector.load %arg8[%c0_152, %c0_153] : memref<1x1xf32, #tpu.memory_space<vmem>>, vector<1x1xf32>
    %436 = vector.broadcast %435 : vector<1x1xf32> to vector<8x1xf32>
    %437 = arith.addf %434, %436 : vector<8x1xf32>
    %c0_154 = arith.constant 0 : index
    %c0_155 = arith.constant 0 : index
    %438 = vector.load %arg9[%c0_154, %c0_155] : memref<8x1xf32, #tpu.memory_space<vmem>>, vector<8x1xf32>
    tpu.vector_store %arg9[%c0_154, %c0_155], %437 {strides = array<i32>} : memref<8x1xf32, #tpu.memory_space<vmem>>, vector<8x1xf32>,
    return
  }
}

</mosaic_0001>

<bundles_post_ra>
// kernel: lstm_model_forward.1
= control target key start
LH: loop header
LB: loop body
LE: loop exit
PB: predicated region body
PF: predicated region fallthrough
CT: control target
= control target key end

     0   :  { %v2433_v0 = vmov 0.0   ;;  %vm2434_vm0 = vmmov 0   ;;  %vm56_vm1 = vcmask 130048   ;;  %v34_v9 = vlaneseq  ;;  %s2436_s25 = smov 32   ;;  %s2437_s11 = smov 96   ;;  %s2966_s1 = inlined_call_operand.vmem [shape: f32[16,128], index: 1, kind: input, shape index: {}]   ;;  %s2967_s2 = inlined_call_operand.vmem [shape: f32[32,128], index: 2, kind: input, shape index: {}]   ;;  %s2968_s0 = inlined_call_operand.vmem [shape: f32[8,8,16], index: 0, kind: input, shape index: {}]   ;;  %s2969_s3 = inlined_call_operand.vmem [shape: f32[1,128], index: 3, kind: input, shape index: {}]   ;;  %s2970_s4 = inlined_call_operand.vmem [shape: f32[32,128], index: 4, kind: input, shape index: {}]   ;;  %s2971_s5 = inlined_call_operand.vmem [shape: f32[32,128], index: 5, kind: input, shape index: {}]   ;;  %s2972_s6 = inlined_call_operand.vmem [shape: f32[1,128], index: 6, kind: input, shape index: {}]   ;;  %s2973_s7 = inlined_call_operand.vmem [shape: f32[1,32], index: 7, kind: input, shape index: {}]   ;;  %s2974_s8 = inlined_call_operand.<no memory space> [shape: f32[1,1], index: 8, kind: input, shape index: {}]   ;;  %s2975_s9 = inlined_call_operand.vmem [shape: f32[8,1], index: 9, kind: output, shape index: {}]  }
   0x1   :  { %2168 = vmatprep.subr.mxu1 %v2433_v0  ;;  %v48_v1 = vld [vmem:[%s2966_s1 + $0x8] sm:$0xff]  ;;  %v2495_v2 = vld [vmem:[%s2967_s2 + $0x18] sm:$0xff]  ;;  %v47_v3 = vld [vmem:[%s2966_s1] sm:$0xff]  ;;  %2176 = vmatprep.mubr.msk.f32.mxu1 %vm2434_vm0, %v2433_v0  ;;  %vm199_vm5 = vcmask 261120   ;;  %v14_v17 = vstv %s2974_s8  ;;  %vm2010_vm6 = vcmask 7168  }
   0x2   :  { %2152 = vmatprep.subr.mxu0 %v48_v1  ;;  %2169 = vmatpush3.msra.mxu1 %v2495_v2  ;;  %v2506_v4 = vld [vmem:[%s2967_s2 + $0x10] sm:$0xff]  ;;  %v39_v5 = vld [vmem:[%s2968_s0] sm:$0xff]  ;;  %v40_v6 = vld [vmem:[%s2968_s0 + $0x8] sm:$0xff]  ;;  %v35_v10 = vand.u32 127, %v34_v9  ;;  %15 = vst [vmem:[#allocation4] sm:$0x1] %v14_v17 }
   0x3   :  { %2153 = vmatpush3.msra.mxu0 %v48_v1  ;;  %2170 = vmatprep.subr.mxu1 %v2433_v0  ;;  %v2519_v7 = vld [vmem:[%s2967_s2 + $0x8] sm:$0xff]  ;;  %v2527_v8 = vld [vmem:[%s2967_s2] sm:$0xff]  ;;  %v41_v49 = vld [vmem:[%s2968_s0 + $0x10] sm:$0xff] }
   0x4   :  { %2154 = vmatprep.subr.mxu0 %v47_v3  ;;  %2171 = vmatpush3.msra.mxu1 %v2506_v4  ;;  %v2556_v12 = vld [vmem:[%s2969_s3] ss:$0 sm:$0xff]  ;;  %vm36_vm2 = vcmp.ge.s32.totalorder %v35_v10, 64  ;;  %vm37_vm3 = vcmp.lt.s32.totalorder %v35_v10, 96  ;;  %s2435_s3 = smov 64   ;;  %v42_v50 = vld [vmem:[%s2968_s0 + $0x18] sm:$0xff] }
   0x5   :  { %2155 = vmatpush3.msra.mxu0 %v47_v3  ;;  %2156 = vmatprep.mubr.msk.f32.mxu0 %vm56_vm1, %v39_v5  ;;  %vm2559_vm4 = vmand %vm36_vm2, %vm37_vm3  ;;  %v43_v51 = vld [vmem:[%s2968_s0 + $0x20] sm:$0xff]  ;;  %v44_v52 = vld [vmem:[%s2968_s0 + $0x28] sm:$0xff] }
   0x6   :  { %2172 = vmatprep.subr.mxu1 %v2433_v0  ;;  %2157 = vmatmul.mubr.msk.f32.vlgmr.msra.gmra.mxu0 %vm56_vm1, %v40_v6  ;;  %v45_v53 = vld [vmem:[%s2968_s0 + $0x30] sm:$0xff]  ;;  %v46_v54 = vld [vmem:[%s2968_s0 + $0x38] sm:$0xff] }
   0x7   :  { %2173 = vmatpush3.msra.mxu1 %v2519_v7  ;;  %2190 = vmatprep.subr.mxu0 %v2433_v0 }
   0x8   :  { %2174 = vmatprep.subr.mxu1 %v2433_v0  ;;  %2191 = vmatpush3.msra.mxu0 %v2495_v2 }
   0x9   :  { %2175 = vmatpush3.msra.mxu1 %v2527_v8  ;;  %2192 = vmatprep.subr.mxu0 %v2433_v0 }
   0xa   :  { %2177 = vmatmul.mubr.f32.vlgmr.msra.gmra.mxu1 %v2433_v0  ;;  %2179 = vmatprep.subr.mxu1 %v2433_v0 }
   0xb   :  { %2180 = vmatpush3.msra.mxu1 %v2495_v2  ;;  %2187 = vmatprep.mubr.msk.f32.mxu1 %vm2434_vm0, %v2433_v0 }
   0xc   :  { %2181 = vmatprep.subr.mxu1 %v2433_v0  ;;  %2193 = vmatpush3.msra.mxu0 %v2506_v4 }
   0xd   :  { %2182 = vmatpush3.msra.mxu1 %v2506_v4  ;;  %2194 = vmatprep.subr.mxu0 %v2433_v0 }
   0xe   :  { %2183 = vmatprep.subr.mxu1 %v2433_v0  ;;  %2195 = vmatpush3.msra.mxu0 %v2519_v7 }
   0xf   :  { %2184 = vmatpush3.msra.mxu1 %v2519_v7  ;;  %2196 = vmatprep.subr.mxu0 %v2433_v0 }
  0x10   :  { %2185 = vmatprep.subr.mxu1 %v2433_v0  ;;  %2197 = vmatpush3.msra.mxu0 %v2527_v8 }
  0x11   :  { %2186 = vmatpush3.msra.mxu1 %v2527_v8  ;;  %2212 = vmatprep.subr.mxu0 %v2433_v0 }
  0x12   :  { %2201 = vmatprep.subr.mxu1 %v2433_v0  ;;  %2159 = vmatprep.mubr.msk.f32.mxu0 %vm56_vm1, %v41_v49 }
  0x13   :  { %2160 = vmatmul.mubr.msk.f32.gmra.mxu0 %vm56_vm1, %v42_v50 }
  0x14   :  { %2162 = vmatprep.mubr.msk.f32.mxu0 %vm56_vm1, %v43_v51 }
  0x17   :  { %2163 = vmatmul.mubr.msk.f32.gmra.mxu0 %vm56_vm1, %v44_v52 }
  0x18   :  { %2165 = vmatprep.mubr.msk.f32.mxu0 %vm56_vm1, %v45_v53 }
  0x1b   :  { %2166 = vmatmul.mubr.msk.f32.gmra.mxu0 %vm56_vm1, %v46_v54 }
  0x1c   :  { %2198 = vmatprep.mubr.msk.f32.mxu0 %vm2434_vm0, %v2433_v0 }
  0xc6   :  { %v2158_v11 = vpop.f32.mrf.mxu0 }
  0xc7   :  { %v153_v34 = vadd.f32 %v2158_v11, %v2556_v12 }
  0xc8   :  { %v147_v13 = vpop.f32.mrf.mxu0 }
  0xc9   :  { %v148_v14 = vadd.f32 %v2556_v12, %v147_v13 }
  0xca   :  { %v269_v15 = vpop.f32.mrf.mxu1 }
  0xcb   :  { %v273_v16 = vadd.f32 %v269_v15, %v148_v14 }
  0xcc   :  { %v2178_v18 = vpop.f32.mrf.mxu1 }
  0xcd   :  { %v274_v19 = vmul.f32 0.5, %v273_v16 }
  0xcf   :  { %v275_v20 = vsel %vm2559_vm4, %v273_v16, %v274_v19 }
  0xd0   :  { %2369 = vtanh.f32 %v275_v20 }
  0xd3   :  { %v2161_v59 = vpop.f32.mrf.mxu0 }
  0xd5   :  { %v157_v60 = vpop.f32.mrf.mxu0 }
  0xd6   :  { %v158_v3 = vadd.f32 %v2556_v12, %v157_v60 }
  0xd7   :  { %v2630_v61 = vpop.f32.mrf.mxu0 }
  0xd9   :  { %v2632_v62 = vpop.f32.mrf.mxu0 }
  0xdb   :  { %v2634_v63 = vpop.f32.mrf.mxu0 }
  0xdd   :  { %v2370_v21 = vpop.eup %2369  ;;  %v2636_v1 = vpop.f32.mrf.mxu0 }
  0xde   :  { %v277_v22 = vmul.f32 0.5, %v2370_v21 }
  0xe0   :  { %v278_v23 = vadd.f32 0.5, %v277_v22 }
  0xe2   :  { %v279_v24 = vsel %vm2559_vm4, %v2370_v21, %v278_v23 }
  0xe3   :  { %282 = vrot.lane.b32.xlu0 %v279_v24, %s2435_s3  ;;  %v280_v27 = vmul.f32 0.0, %v279_v24 }
 0x155   :  { %v283_v25 = vpop.permute.xlu0 %282 }
 0x156   :  { %v285_v26 = vmul.f32 %v283_v25, %v279_v24 }
 0x158   :  { %287 = vrot.lane.b32.xlu0 %v285_v26, %s2436_s25 }
 0x1ca   :  { %v288_v28 = vpop.permute.xlu0 %287 }
 0x1cb   :  { %v290_v29 = vadd.f32 %v288_v28, %v280_v27  ;;  %v163_v27 = vadd.f32 %v2161_v59, %v2556_v12 }
 0x1cd   :  { %2371 = vtanh.f32 %v290_v29 }
 0x1da   :  { %v2372_v30 = vpop.eup %2371 }
 0x1db   :  { %293 = vrot.lane.b32.xlu1 %v2372_v30, %s2435_s3 }
 0x24d   :  { %v294_v31 = vpop.permute.xlu1 %293 }
 0x24e   :  { %v296_v32 = vmul.f32 %v294_v31, %v279_v24 }
 0x250   :  { %298 = vrot.lane.b32.xlu1 %v296_v32, %s2436_s25 }
 0x2c2   :  { %v299_v33 = vpop.permute.xlu1 %298 }
 0x2c3   :  { %301 = vst.msk [vmem:[#allocation3] sm:$0xff] %vm199_vm5, %v299_v33  ;;  %2188 = vmatmul.mubr.msk.f32.vlgmr.msra.gmra.mxu1 %vm199_vm5, %v299_v33 }
 0x2c4   :  { %2202 = vmatpush3.msra.mxu1 %v2495_v2  ;;  %2209 = vmatprep.mubr.msk.f32.mxu1 %vm2434_vm0, %v2433_v0 }
 0x2c5   :  { %2203 = vmatprep.subr.mxu1 %v2433_v0 }
 0x2c6   :  { %2204 = vmatpush3.msra.mxu1 %v2506_v4 }
 0x2c7   :  { %2205 = vmatprep.subr.mxu1 %v2433_v0 }
 0x2c8   :  { %2206 = vmatpush3.msra.mxu1 %v2519_v7 }
 0x2c9   :  { %2207 = vmatprep.subr.mxu1 %v2433_v0 }
 0x2ca   :  { %2208 = vmatpush3.msra.mxu1 %v2527_v8 }
 0x2cb   :  { %2223 = vmatprep.subr.mxu1 %v2433_v0 }
 0x383   :  { %v372_v35 = vpop.f32.mrf.mxu1 }
 0x384   :  { %v376_v36 = vadd.f32 %v372_v35, %v153_v34 }
 0x385   :  { %v2189_v37 = vpop.f32.mrf.mxu1 }
 0x386   :  { %v377_v38 = vmul.f32 0.5, %v376_v36 }
 0x388   :  { %v378_v39 = vsel %vm2559_vm4, %v376_v36, %v377_v38 }
 0x389   :  { %2373 = vtanh.f32 %v378_v39 }
 0x396   :  { %v2374_v40 = vpop.eup %2373 }
 0x397   :  { %v380_v41 = vmul.f32 0.5, %v2374_v40 }
 0x399   :  { %v381_v42 = vadd.f32 0.5, %v380_v41 }
 0x39b   :  { %v382_v43 = vsel %vm2559_vm4, %v2374_v40, %v381_v42 }
 0x39c   :  { %385 = vrot.lane.b32.xlu0 %v382_v43, %s2435_s3  ;;  %v383_v46 = vmul.f32 %v382_v43, %v290_v29 }
 0x40e   :  { %v386_v44 = vpop.permute.xlu0 %385 }
 0x40f   :  { %v388_v45 = vmul.f32 %v386_v44, %v382_v43 }
 0x411   :  { %390 = vrot.lane.b32.xlu1 %v388_v45, %s2436_s25 }
 0x483   :  { %v391_v47 = vpop.permute.xlu1 %390 }
 0x484   :  { %v393_v48 = vadd.f32 %v391_v47, %v383_v46  ;;  %v168_v46 = vadd.f32 %v2556_v12, %v2632_v62 }
 0x486   :  { %2375 = vtanh.f32 %v393_v48 }
 0x493   :  { %v2376_v55 = vpop.eup %2375 }
 0x494   :  { %396 = vrot.lane.b32.xlu0 %v2376_v55, %s2435_s3 }
 0x506   :  { %v397_v56 = vpop.permute.xlu0 %396 }
 0x507   :  { %v399_v57 = vmul.f32 %v397_v56, %v382_v43 }
 0x509   :  { %401 = vrot.lane.b32.xlu1 %v399_v57, %s2436_s25 }
 0x57b   :  { %v402_v58 = vpop.permute.xlu1 %401 }
 0x57c   :  { %405 = vst.msk [vmem:[#allocation3 + $0x8] sm:$0xff] %vm199_vm5, %v402_v58  ;;  %2199 = vmatmul.mubr.msk.f32.vlgmr.msra.gmra.mxu0 %vm199_vm5, %v402_v58 }
 0x57d   :  { %2213 = vmatpush3.msra.mxu0 %v2495_v2  ;;  %2220 = vmatprep.mubr.msk.f32.mxu0 %vm2434_vm0, %v2433_v0 }
 0x57e   :  { %2214 = vmatprep.subr.mxu0 %v2433_v0 }
 0x57f   :  { %2215 = vmatpush3.msra.mxu0 %v2506_v4 }
 0x580   :  { %2216 = vmatprep.subr.mxu0 %v2433_v0 }
 0x581   :  { %2217 = vmatpush3.msra.mxu0 %v2519_v7 }
 0x582   :  { %2218 = vmatprep.subr.mxu0 %v2433_v0 }
 0x583   :  { %2219 = vmatpush3.msra.mxu0 %v2527_v8 }
 0x584   :  { %2234 = vmatprep.subr.mxu0 %v2433_v0 }
 0x63c   :  { %v476_v5 = vpop.f32.mrf.mxu0 }
 0x63d   :  { %v480_v6 = vadd.f32 %v476_v5, %v158_v3 }
 0x63e   :  { %v2200_v9 = vpop.f32.mrf.mxu0 }
 0x63f   :  { %v481_v10 = vmul.f32 0.5, %v480_v6 }
 0x641   :  { %v482_v11 = vsel %vm2559_vm4, %v480_v6, %v481_v10 }
 0x642   :  { %2377 = vtanh.f32 %v482_v11 }
 0x64f   :  { %v2378_v13 = vpop.eup %2377 }
 0x650   :  { %v484_v14 = vmul.f32 0.5, %v2378_v13 }
 0x652   :  { %v485_v15 = vadd.f32 0.5, %v484_v14 }
 0x654   :  { %v486_v16 = vsel %vm2559_vm4, %v2378_v13, %v485_v15 }
 0x655   :  { %489 = vrot.lane.b32.xlu0 %v486_v16, %s2435_s3  ;;  %v487_v20 = vmul.f32 %v486_v16, %v393_v48 }
 0x6c7   :  { %v490_v18 = vpop.permute.xlu0 %489 }
 0x6c8   :  { %v492_v19 = vmul.f32 %v490_v18, %v486_v16 }
 0x6ca   :  { %494 = vrot.lane.b32.xlu1 %v492_v19, %s2436_s25 }
 0x73c   :  { %v495_v21 = vpop.permute.xlu1 %494 }
 0x73d   :  { %v497_v22 = vadd.f32 %v495_v21, %v487_v20  ;;  %v1041_v21 = vld [vmem:[%s2970_s4 + $0x18] sm:$0xff] }
 0x73f   :  { %2379 = vtanh.f32 %v497_v22 }
 0x74c   :  { %v2380_v23 = vpop.eup %2379 }
 0x74d   :  { %500 = vrot.lane.b32.xlu0 %v2380_v23, %s2435_s3 }
 0x7bf   :  { %v501_v24 = vpop.permute.xlu0 %500 }
 0x7c0   :  { %v503_v25 = vmul.f32 %v501_v24, %v486_v16 }
 0x7c2   :  { %505 = vrot.lane.b32.xlu1 %v503_v25, %s2436_s25 }
 0x834   :  { %v506_v26 = vpop.permute.xlu1 %505 }
 0x835   :  { %509 = vst.msk [vmem:[#allocation3 + $0x10] sm:$0xff] %vm199_vm5, %v506_v26  ;;  %2210 = vmatmul.mubr.msk.f32.vlgmr.msra.gmra.mxu1 %vm199_vm5, %v506_v26  ;;  %v1040_v26 = vld [vmem:[%s2970_s4 + $0x10] sm:$0xff] }
 0x836   :  { %2224 = vmatpush3.msra.mxu1 %v2495_v2  ;;  %2231 = vmatprep.mubr.msk.f32.mxu1 %vm2434_vm0, %v2433_v0 }
 0x837   :  { %2225 = vmatprep.subr.mxu1 %v2433_v0 }
 0x838   :  { %2226 = vmatpush3.msra.mxu1 %v2506_v4 }
 0x839   :  { %2227 = vmatprep.subr.mxu1 %v2433_v0 }
 0x83a   :  { %2228 = vmatpush3.msra.mxu1 %v2519_v7 }
 0x83b   :  { %2229 = vmatprep.subr.mxu1 %v2433_v0 }
 0x83c   :  { %2230 = vmatpush3.msra.mxu1 %v2527_v8 }
 0x83d   :  { %2245 = vmatprep.subr.mxu1 %v2433_v0 }
 0x8f5   :  { %v580_v28 = vpop.f32.mrf.mxu1 }
 0x8f6   :  { %v584_v29 = vadd.f32 %v580_v28, %v163_v27  ;;  %v1030_v27 = vld [vmem:[#allocation3] sm:$0xff]  ;;  %v1039_v28 = vld [vmem:[%s2970_s4 + $0x8] sm:$0xff] }
 0x8f7   :  { %v2211_v30 = vpop.f32.mrf.mxu1 }
 0x8f8   :  { %v585_v31 = vmul.f32 0.5, %v584_v29  ;;  %v1031_v30 = vld [vmem:[#allocation3 + $0x8] sm:$0xff] }
 0x8fa   :  { %v586_v32 = vsel %vm2559_vm4, %v584_v29, %v585_v31  ;;  %v1038_v29 = vld [vmem:[%s2970_s4] sm:$0xff]  ;;  %v1032_v31 = vld [vmem:[#allocation3 + $0x10] sm:$0xff] }
 0x8fb   :  { %2381 = vtanh.f32 %v586_v32 }
 0x908   :  { %v2382_v33 = vpop.eup %2381 }
 0x909   :  { %v588_v34 = vmul.f32 0.5, %v2382_v33 }
 0x90b   :  { %v589_v35 = vadd.f32 0.5, %v588_v34 }
 0x90d   :  { %v590_v36 = vsel %vm2559_vm4, %v2382_v33, %v589_v35  ;;  %v178_v35 = vadd.f32 %v2556_v12, %v2636_v1 }
 0x90e   :  { %593 = vrot.lane.b32.xlu0 %v590_v36, %s2435_s3  ;;  %v591_v39 = vmul.f32 %v590_v36, %v497_v22 }
 0x980   :  { %v594_v37 = vpop.permute.xlu0 %593 }
 0x981   :  { %v596_v38 = vmul.f32 %v594_v37, %v590_v36 }
 0x983   :  { %598 = vrot.lane.b32.xlu1 %v596_v38, %s2436_s25 }
 0x9f5   :  { %v599_v40 = vpop.permute.xlu1 %598 }
 0x9f6   :  { %v601_v41 = vadd.f32 %v599_v40, %v591_v39 }
 0x9f8   :  { %2383 = vtanh.f32 %v601_v41 }
 0xa05   :  { %v2384_v42 = vpop.eup %2383 }
 0xa06   :  { %604 = vrot.lane.b32.xlu0 %v2384_v42, %s2435_s3 }
 0xa78   :  { %v605_v43 = vpop.permute.xlu0 %604 }
 0xa79   :  { %v607_v44 = vmul.f32 %v605_v43, %v590_v36 }
 0xa7b   :  { %609 = vrot.lane.b32.xlu1 %v607_v44, %s2436_s25 }
 0xaed   :  { %v610_v45 = vpop.permute.xlu1 %609 }
 0xaee   :  { %613 = vst.msk [vmem:[#allocation3 + $0x18] sm:$0xff] %vm199_vm5, %v610_v45  ;;  %2221 = vmatmul.mubr.msk.f32.vlgmr.msra.gmra.mxu0 %vm199_vm5, %v610_v45 }
 0xaef   :  { %2235 = vmatpush3.msra.mxu0 %v2495_v2  ;;  %2242 = vmatprep.mubr.msk.f32.mxu0 %vm2434_vm0, %v2433_v0 }
 0xaf0   :  { %2236 = vmatprep.subr.mxu0 %v2433_v0 }
 0xaf1   :  { %2237 = vmatpush3.msra.mxu0 %v2506_v4 }
 0xaf2   :  { %2238 = vmatprep.subr.mxu0 %v2433_v0 }
 0xaf3   :  { %2239 = vmatpush3.msra.mxu0 %v2519_v7 }
 0xaf4   :  { %2240 = vmatprep.subr.mxu0 %v2433_v0 }
 0xaf5   :  { %2241 = vmatpush3.msra.mxu0 %v2527_v8  ;;  %v1033_v32 = vld [vmem:[#allocation3 + $0x18] sm:$0xff] }
 0xaf6   :  { %2256 = vmatprep.subr.mxu0 %v1041_v21 }
 0xbae   :  { %v684_v47 = vpop.f32.mrf.mxu0 }
 0xbaf   :  { %v688_v48 = vadd.f32 %v684_v47, %v168_v46 }
 0xbb0   :  { %v2222_v49 = vpop.f32.mrf.mxu0 }
 0xbb1   :  { %v689_v50 = vmul.f32 0.5, %v688_v48 }
 0xbb3   :  { %v690_v51 = vsel %vm2559_vm4, %v688_v48, %v689_v50  ;;  %v2747_v50 = vld [vmem:[%s2971_s5 + $0x18] sm:$0xff] }
 0xbb4   :  { %2385 = vtanh.f32 %v690_v51  ;;  %v2753_v51 = vld [vmem:[%s2971_s5 + $0x10] sm:$0xff] }
 0xbc1   :  { %v2386_v52 = vpop.eup %2385 }
 0xbc2   :  { %v692_v53 = vmul.f32 0.5, %v2386_v52 }
 0xbc4   :  { %v693_v54 = vadd.f32 0.5, %v692_v53  ;;  %v2767_v53 = vld [vmem:[%s2971_s5] sm:$0xff] }
 0xbc6   :  { %v694_v55 = vsel %vm2559_vm4, %v2386_v52, %v693_v54  ;;  %v2760_v52 = vld [vmem:[%s2971_s5 + $0x8] sm:$0xff] }
 0xbc7   :  { %697 = vrot.lane.b32.xlu0 %v694_v55, %s2435_s3  ;;  %v695_v58 = vmul.f32 %v694_v55, %v601_v41 }
 0xc39   :  { %v698_v56 = vpop.permute.xlu0 %697 }
 0xc3a   :  { %v700_v57 = vmul.f32 %v698_v56, %v694_v55 }
 0xc3c   :  { %702 = vrot.lane.b32.xlu1 %v700_v57, %s2436_s25 }
 0xcae   :  { %v703_v59 = vpop.permute.xlu1 %702 }
 0xcaf   :  { %v705_v60 = vadd.f32 %v703_v59, %v695_v58  ;;  %v183_v58 = vadd.f32 %v2634_v63, %v2556_v12 }
 0xcb1   :  { %2387 = vtanh.f32 %v705_v60 }
 0xcbe   :  { %v2388_v62 = vpop.eup %2387 }
 0xcbf   :  { %708 = vrot.lane.b32.xlu0 %v2388_v62, %s2435_s3 }
 0xd31   :  { %v709_v3 = vpop.permute.xlu0 %708 }
 0xd32   :  { %v711_v5 = vmul.f32 %v709_v3, %v694_v55 }
 0xd34   :  { %713 = vrot.lane.b32.xlu1 %v711_v5, %s2436_s25 }
 0xda6   :  { %v714_v6 = vpop.permute.xlu1 %713 }
 0xda7   :  { %717 = vst.msk [vmem:[#allocation3 + $0x20] sm:$0xff] %vm199_vm5, %v714_v6  ;;  %2232 = vmatmul.mubr.msk.f32.vlgmr.msra.gmra.mxu1 %vm199_vm5, %v714_v6  ;;  %v2802_v6 = vld [vmem:[%s2972_s6] ss:$0 sm:$0xff] }
 0xda8   :  { %2246 = vmatpush3.msra.mxu1 %v2495_v2  ;;  %2253 = vmatprep.mubr.msk.f32.mxu1 %vm2434_vm0, %v2433_v0  ;;  %v173_v2 = vadd.f32 %v2630_v61, %v2556_v12 }
 0xda9   :  { %2247 = vmatprep.subr.mxu1 %v2433_v0 }
 0xdaa   :  { %2248 = vmatpush3.msra.mxu1 %v2506_v4 }
 0xdab   :  { %2249 = vmatprep.subr.mxu1 %v2433_v0 }
 0xdac   :  { %2250 = vmatpush3.msra.mxu1 %v2519_v7 }
 0xdad   :  { %2251 = vmatprep.subr.mxu1 %v2433_v0 }
 0xdae   :  { %2252 = vmatpush3.msra.mxu1 %v2527_v8  ;;  %v1034_v33 = vld [vmem:[#allocation3 + $0x20] sm:$0xff] }
 0xdaf   :  { %2276 = vmatprep.subr.mxu1 %v2433_v0 }
 0xe67   :  { %v788_v9 = vpop.f32.mrf.mxu1 }
 0xe68   :  { %v792_v10 = vadd.f32 %v788_v9, %v173_v2 }
 0xe69   :  { %v2233_v11 = vpop.f32.mrf.mxu1 }
 0xe6a   :  { %v793_v13 = vmul.f32 0.5, %v792_v10 }
 0xe6c   :  { %v794_v4 = vsel %vm2559_vm4, %v792_v10, %v793_v13 }
 0xe6d   :  { %2389 = vtanh.f32 %v794_v4 }
 0xe7a   :  { %v2390_v14 = vpop.eup %2389 }
 0xe7b   :  { %v796_v15 = vmul.f32 0.5, %v2390_v14 }
 0xe7d   :  { %v797_v7 = vadd.f32 0.5, %v796_v15 }
 0xe7f   :  { %v798_v16 = vsel %vm2559_vm4, %v2390_v14, %v797_v7 }
 0xe80   :  { %801 = vrot.lane.b32.xlu0 %v798_v16, %s2435_s3  ;;  %v799_v61 = vmul.f32 %v798_v16, %v705_v60 }
 0xef2   :  { %v802_v8 = vpop.permute.xlu0 %801 }
 0xef3   :  { %v804_v18 = vmul.f32 %v802_v8, %v798_v16 }
 0xef5   :  { %806 = vrot.lane.b32.xlu1 %v804_v18, %s2436_s25 }
 0xf67   :  { %v807_v19 = vpop.permute.xlu1 %806 }
 0xf68   :  { %v809_v20 = vadd.f32 %v807_v19, %v799_v61 }
 0xf6a   :  { %2391 = vtanh.f32 %v809_v20 }
 0xf77   :  { %v2392_v22 = vpop.eup %2391 }
 0xf78   :  { %812 = vrot.lane.b32.xlu0 %v2392_v22, %s2435_s3 }
 0xfea   :  { %v813_v23 = vpop.permute.xlu0 %812 }
 0xfeb   :  { %v815_v24 = vmul.f32 %v813_v23, %v798_v16 }
 0xfed   :  { %817 = vrot.lane.b32.xlu1 %v815_v24, %s2436_s25 }
0x105f   :  { %v818_v25 = vpop.permute.xlu1 %817 }
0x1060   :  { %821 = vst.msk [vmem:[#allocation3 + $0x28] sm:$0xff] %vm199_vm5, %v818_v25  ;;  %2243 = vmatmul.mubr.msk.f32.vlgmr.msra.gmra.mxu0 %vm199_vm5, %v818_v25 }
0x1061   :  { %2257 = vmatpush3.msra.mxu0 %v1041_v21  ;;  %2264 = vmatprep.mubr.msk.f32.mxu0 %vm199_vm5, %v1030_v27 }
0x1062   :  { %2258 = vmatprep.subr.mxu0 %v1040_v26 }
0x1063   :  { %2259 = vmatpush3.msra.mxu0 %v1040_v26 }
0x1064   :  { %2260 = vmatprep.subr.mxu0 %v1039_v28 }
0x1065   :  { %2261 = vmatpush3.msra.mxu0 %v1039_v28 }
0x1066   :  { %2262 = vmatprep.subr.mxu0 %v1038_v29 }
0x1067   :  { %2263 = vmatpush3.msra.mxu0 %v1038_v29  ;;  %v1035_v34 = vld [vmem:[#allocation3 + $0x28] sm:$0xff] }
0x1068   :  { %2265 = vmatmul.mubr.msk.f32.vlgmr.msra.gmra.mxu0 %vm199_vm5, %v1031_v30  ;;  %2298 = vmatprep.subr.mxu0 %v2433_v0 }
0x1069   :  { %2267 = vmatprep.mubr.msk.f32.mxu0 %vm199_vm5, %v1032_v31  ;;  %2299 = vmatpush3.msra.mxu0 %v2747_v50 }
0x106a   :  { %2300 = vmatprep.subr.mxu0 %v2433_v0 }
0x106b   :  { %2301 = vmatpush3.msra.mxu0 %v2753_v51 }
0x106c   :  { %2268 = vmatmul.mubr.msk.f32.gmra.mxu0 %vm199_vm5, %v1033_v32  ;;  %2302 = vmatprep.subr.mxu0 %v2433_v0 }
0x106d   :  { %2270 = vmatprep.mubr.msk.f32.mxu0 %vm199_vm5, %v1034_v33  ;;  %2303 = vmatpush3.msra.mxu0 %v2760_v52 }
0x106e   :  { %2304 = vmatprep.subr.mxu0 %v2433_v0 }
0x106f   :  { %2305 = vmatpush3.msra.mxu0 %v2767_v53 }
0x1070   :  { %2271 = vmatmul.mubr.msk.f32.gmra.mxu0 %vm199_vm5, %v1035_v34  ;;  %2320 = vmatprep.subr.mxu0 %v2433_v0 }
0x1120   :  { %v892_v36 = vpop.f32.mrf.mxu0 }
0x1121   :  { %v896_v37 = vadd.f32 %v892_v36, %v178_v35 }
0x1122   :  { %v2244_v38 = vpop.f32.mrf.mxu0 }
0x1123   :  { %v897_v39 = vmul.f32 0.5, %v896_v37 }
0x1125   :  { %v898_v40 = vsel %vm2559_vm4, %v896_v37, %v897_v39 }
0x1126   :  { %2393 = vtanh.f32 %v898_v40 }
0x1128   :  { %v2266_v59 = vpop.f32.mrf.mxu0 }
0x1129   :  { %v1145_v37 = vadd.f32 %v2266_v59, %v2802_v6 }
0x112a   :  { %v1139_v5 = vpop.f32.mrf.mxu0 }
0x112b   :  { %v1140_v2 = vadd.f32 %v2802_v6, %v1139_v5 }
0x1133   :  { %v2394_v41 = vpop.eup %2393 }
0x1134   :  { %v900_v42 = vmul.f32 0.5, %v2394_v41 }
0x1136   :  { %v901_v43 = vadd.f32 0.5, %v900_v42 }
0x1138   :  { %v902_v44 = vsel %vm2559_vm4, %v2394_v41, %v901_v43 }
0x1139   :  { %905 = vrot.lane.b32.xlu0 %v902_v44, %s2435_s3  ;;  %v903_v1 = vmul.f32 %v902_v44, %v809_v20 }
0x11ab   :  { %v906_v45 = vpop.permute.xlu0 %905 }
0x11ac   :  { %v908_v46 = vmul.f32 %v906_v45, %v902_v44 }
0x11ae   :  { %910 = vrot.lane.b32.xlu1 %v908_v46, %s2436_s25 }
0x1220   :  { %v911_v47 = vpop.permute.xlu1 %910 }
0x1221   :  { %v2740_v48 = vadd.f32 %v911_v47, %v903_v1 }
0x1223   :  { %2395 = vtanh.f32 %v2740_v48 }
0x1230   :  { %v2396_v49 = vpop.eup %2395 }
0x1231   :  { %916 = vrot.lane.b32.xlu0 %v2396_v49, %s2435_s3 }
0x12a3   :  { %v917_v54 = vpop.permute.xlu0 %916 }
0x12a4   :  { %v919_v55 = vmul.f32 %v917_v54, %v902_v44 }
0x12a6   :  { %921 = vrot.lane.b32.xlu1 %v919_v55, %s2436_s25 }
0x1318   :  { %v922_v56 = vpop.permute.xlu1 %921 }
0x1319   :  { %925 = vst.msk [vmem:[#allocation3 + $0x30] sm:$0xff] %vm199_vm5, %v922_v56  ;;  %2254 = vmatmul.mubr.msk.f32.vlgmr.msra.gmra.mxu1 %vm199_vm5, %v922_v56 }
0x131a   :  { %2277 = vmatpush3.msra.mxu1 %v2747_v50  ;;  %2284 = vmatprep.mubr.msk.f32.mxu1 %vm2434_vm0, %v2433_v0 }
0x131b   :  { %2278 = vmatprep.subr.mxu1 %v2433_v0 }
0x131c   :  { %2279 = vmatpush3.msra.mxu1 %v2753_v51 }
0x131d   :  { %2280 = vmatprep.subr.mxu1 %v2433_v0 }
0x131e   :  { %2281 = vmatpush3.msra.mxu1 %v2760_v52 }
0x131f   :  { %2282 = vmatprep.subr.mxu1 %v2433_v0 }
0x1320   :  { %2283 = vmatpush3.msra.mxu1 %v2767_v53  ;;  %v1036_v57 = vld [vmem:[#allocation3 + $0x30] sm:$0xff] }
0x1321   :  { %2285 = vmatmul.mubr.f32.vlgmr.msra.gmra.mxu1 %v2433_v0  ;;  %2273 = vmatprep.mubr.msk.f32.mxu0 %vm199_vm5, %v1036_v57 }
0x1322   :  { %2287 = vmatprep.subr.mxu1 %v2433_v0  ;;  %2295 = vmatprep.mubr.msk.f32.mxu1 %vm2434_vm0, %v2433_v0 }
0x1323   :  { %2288 = vmatpush3.msra.mxu1 %v2747_v50 }
0x1324   :  { %2289 = vmatprep.subr.mxu1 %v2433_v0 }
0x1325   :  { %2290 = vmatpush3.msra.mxu1 %v2753_v51 }
0x1326   :  { %2291 = vmatprep.subr.mxu1 %v2433_v0 }
0x1327   :  { %2292 = vmatpush3.msra.mxu1 %v2760_v52 }
0x1328   :  { %2293 = vmatprep.subr.mxu1 %v2433_v0 }
0x1329   :  { %2294 = vmatpush3.msra.mxu1 %v2767_v53 }
0x132a   :  { %2309 = vmatprep.subr.mxu1 %v2433_v0 }
0x13d9   :  { %v996_v60 = vpop.f32.mrf.mxu1 }
0x13da   :  { %v1000_v62 = vadd.f32 %v996_v60, %v183_v58 }
0x13db   :  { %v2255_v3 = vpop.f32.mrf.mxu1 }
0x13dc   :  { %v1001_v8 = vmul.f32 0.5, %v1000_v62 }
0x13de   :  { %v1002_v18 = vsel %vm2559_vm4, %v1000_v62, %v1001_v8  ;;  %v2269_v62 = vpop.f32.mrf.mxu0 }
0x13e0   :  { %v1149_v3 = vpop.f32.mrf.mxu0 }
0x13e1   :  { %v1257_v9 = vpop.f32.mrf.mxu1 }
0x13e2   :  { %v1261_v10 = vadd.f32 %v1257_v9, %v1140_v2  ;;  %v2857_v5 = vpop.f32.mrf.mxu0 }
0x13e3   :  { %v2286_v11 = vpop.f32.mrf.mxu1 }
0x13e4   :  { %v1262_v13 = vmul.f32 0.5, %v1261_v10  ;;  %v2859_v2 = vpop.f32.mrf.mxu0  ;;  %v1150_v11 = vadd.f32 %v2802_v6, %v1149_v3 }
0x13e6   :  { %v1263_v4 = vsel %vm2559_vm4, %v1261_v10, %v1262_v13 }
0x13e7   :  { %2397 = vtanh.f32 %v1263_v4 }
0x13e8   :  { %2399 = vtanh.f32 %v1002_v18 }
0x13f4   :  { %v2398_v12 = vpop.eup %2397 }
0x13f5   :  { %v1265_v63 = vmul.f32 0.5, %v2398_v12  ;;  %v2400_v21 = vpop.eup %2399 }
0x13f6   :  { %v1004_v22 = vmul.f32 0.5, %v2400_v21 }
0x13f7   :  { %v1266_v14 = vadd.f32 0.5, %v1265_v63 }
0x13f8   :  { %v1005_v24 = vadd.f32 0.5, %v1004_v22 }
0x13f9   :  { %v1267_v15 = vsel %vm2559_vm4, %v2398_v12, %v1266_v14 }
0x13fa   :  { %1270 = vrot.lane.b32.xlu0 %v1267_v15, %s2435_s3  ;;  %v1268_v61 = vmul.f32 0.0, %v1267_v15  ;;  %v1006_v25 = vsel %vm2559_vm4, %v2400_v21, %v1005_v24 }
0x13fb   :  { %v1007_v31 = vmul.f32 %v1006_v25, %v2740_v48 }
0x146c   :  { %v1271_v7 = vpop.permute.xlu0 %1270 }
0x146d   :  { %v1273_v16 = vmul.f32 %v1271_v7, %v1267_v15 }
0x146f   :  { %1275 = vrot.lane.b32.xlu1 %v1273_v16, %s2436_s25 }
0x14e1   :  { %v1276_v19 = vpop.permute.xlu1 %1275 }
0x14e2   :  { %v1278_v20 = vadd.f32 %v1276_v19, %v1268_v61 }
0x14e4   :  { %2401 = vtanh.f32 %v1278_v20 }
0x14f1   :  { %v2402_v23 = vpop.eup %2401 }
0x14f2   :  { %1281 = vrot.lane.b32.xlu0 %v2402_v23, %s2435_s3 }
0x14f6   :  { %1009 = vrot.lane.b32.xlu0 %v1006_v25, %s2435_s3 }
0x1564   :  { %v1282_v26 = vpop.permute.xlu0 %1281 }
0x1565   :  { %v1284_v27 = vmul.f32 %v1282_v26, %v1267_v15  ;;  %v1155_v26 = vadd.f32 %v2269_v62, %v2802_v6 }
0x1567   :  { %1287 = vrot.lane.b32.xlu1 %v1284_v27, %s2436_s25 }
0x1568   :  { %v1010_v28 = vpop.permute.xlu0 %1009 }
0x1569   :  { %v1012_v29 = vmul.f32 %v1010_v28, %v1006_v25 }
0x156b   :  { %1014 = vrot.lane.b32.xlu0 %v1012_v29, %s2436_s25 }
0x15d9   :  { %v1288_v30 = vpop.permute.xlu1 %1287 }
0x15da   :  { %2296 = vmatmul.mubr.msk.f32.vlgmr.msra.gmra.mxu1 %vm199_vm5, %v1288_v30 }
0x15db   :  { %2310 = vmatpush3.msra.mxu1 %v2747_v50  ;;  %2317 = vmatprep.mubr.msk.f32.mxu1 %vm2434_vm0, %v2433_v0 }
0x15dc   :  { %2311 = vmatprep.subr.mxu1 %v2433_v0 }
0x15dd   :  { %v1015_v32 = vpop.permute.xlu0 %1014  ;;  %2312 = vmatpush3.msra.mxu1 %v2753_v51 }
0x15de   :  { %v1017_v33 = vadd.f32 %v1015_v32, %v1007_v31  ;;  %2313 = vmatprep.subr.mxu1 %v2433_v0 }
0x15df   :  { %2314 = vmatpush3.msra.mxu1 %v2760_v52 }
0x15e0   :  { %2403 = vtanh.f32 %v1017_v33  ;;  %2315 = vmatprep.subr.mxu1 %v2433_v0 }
0x15e1   :  { %2316 = vmatpush3.msra.mxu1 %v2767_v53 }
0x15e2   :  { %2331 = vmatprep.subr.mxu1 %v2433_v0 }
0x15ed   :  { %v2404_v34 = vpop.eup %2403 }
0x15ee   :  { %1020 = vrot.lane.b32.xlu0 %v2404_v34, %s2435_s3 }
0x1660   :  { %v1021_v35 = vpop.permute.xlu0 %1020 }
0x1661   :  { %v1023_v36 = vmul.f32 %v1021_v35, %v1006_v25 }
0x1663   :  { %1025 = vrot.lane.b32.xlu0 %v1023_v36, %s2436_s25 }
0x169a   :  { %v1357_v38 = vpop.f32.mrf.mxu1 }
0x169b   :  { %v1361_v39 = vadd.f32 %v1357_v38, %v1145_v37 }
0x169c   :  { %v2297_v40 = vpop.f32.mrf.mxu1 }
0x169d   :  { %v1362_v41 = vmul.f32 0.5, %v1361_v39 }
0x169f   :  { %v1363_v42 = vsel %vm2559_vm4, %v1361_v39, %v1362_v41 }
0x16a0   :  { %2405 = vtanh.f32 %v1363_v42 }
0x16ad   :  { %v2406_v43 = vpop.eup %2405 }
0x16ae   :  { %v1365_v44 = vmul.f32 0.5, %v2406_v43 }
0x16b0   :  { %v1366_v45 = vadd.f32 0.5, %v1365_v44 }
0x16b2   :  { %v1367_v46 = vsel %vm2559_vm4, %v2406_v43, %v1366_v45  ;;  %v1160_v45 = vadd.f32 %v2802_v6, %v2859_v2 }
0x16b3   :  { %1370 = vrot.lane.b32.xlu1 %v1367_v46, %s2435_s3  ;;  %v1368_v54 = vmul.f32 %v1367_v46, %v1278_v20 }
0x16d5   :  { %v1026_v1 = vpop.permute.xlu0 %1025 }
0x16d6   :  { %1029 = vst.msk [vmem:[#allocation3 + $0x38] sm:$0xff] %vm199_vm5, %v1026_v1 }
0x16dd   :  { %v1037_v47 = vld [vmem:[#allocation3 + $0x38] sm:$0xff] }
0x16de   :  { %2274 = vmatmul.mubr.msk.f32.gmra.mxu0 %vm199_vm5, %v1037_v47 }
0x16df   :  { %2306 = vmatprep.mubr.msk.f32.mxu0 %vm2434_vm0, %v2433_v0 }
0x1725   :  { %v1371_v48 = vpop.permute.xlu1 %1370 }
0x1726   :  { %v1373_v49 = vmul.f32 %v1371_v48, %v1367_v46 }
0x1728   :  { %1375 = vrot.lane.b32.xlu1 %v1373_v49, %s2436_s25 }
0x179a   :  { %v1376_v55 = vpop.permute.xlu1 %1375 }
0x179b   :  { %v1378_v56 = vadd.f32 %v1376_v55, %v1368_v54 }
0x179d   :  { %2407 = vtanh.f32 %v1378_v56 }
0x179e   :  { %v2861_v9 = vpop.f32.mrf.mxu0 }
0x17a0   :  { %v2863_v10 = vpop.f32.mrf.mxu0 }
0x17aa   :  { %v2408_v57 = vpop.eup %2407 }
0x17ab   :  { %1381 = vrot.lane.b32.xlu1 %v2408_v57, %s2435_s3 }
0x181d   :  { %v1382_v58 = vpop.permute.xlu1 %1381 }
0x181e   :  { %v1384_v59 = vmul.f32 %v1382_v58, %v1367_v46 }
0x1820   :  { %1387 = vrot.lane.b32.xlu1 %v1384_v59, %s2436_s25 }
0x1892   :  { %v1388_v60 = vpop.permute.xlu1 %1387 }
0x1893   :  { %2307 = vmatmul.mubr.msk.f32.vlgmr.msra.gmra.mxu0 %vm199_vm5, %v1388_v60 }
0x1894   :  { %2321 = vmatpush3.msra.mxu0 %v2747_v50  ;;  %2328 = vmatprep.mubr.msk.f32.mxu0 %vm2434_vm0, %v2433_v0 }
0x1895   :  { %2322 = vmatprep.subr.mxu0 %v2433_v0 }
0x1896   :  { %2323 = vmatpush3.msra.mxu0 %v2753_v51 }
0x1897   :  { %2324 = vmatprep.subr.mxu0 %v2433_v0 }
0x1898   :  { %2325 = vmatpush3.msra.mxu0 %v2760_v52 }
0x1899   :  { %2326 = vmatprep.subr.mxu0 %v2433_v0 }
0x189a   :  { %2327 = vmatpush3.msra.mxu0 %v2767_v53 }
0x189b   :  { %2342 = vmatprep.subr.mxu0 %v2433_v0 }
0x1953   :  { %v1457_v13 = vpop.f32.mrf.mxu0 }
0x1954   :  { %v1461_v4 = vadd.f32 %v1457_v13, %v1150_v11 }
0x1955   :  { %v2308_v12 = vpop.f32.mrf.mxu0 }
0x1956   :  { %v1462_v63 = vmul.f32 0.5, %v1461_v4  ;;  %v1165_v12 = vadd.f32 %v2857_v5, %v2802_v6 }
0x1958   :  { %v1463_v14 = vsel %vm2559_vm4, %v1461_v4, %v1462_v63 }
0x1959   :  { %2409 = vtanh.f32 %v1463_v14 }
0x1966   :  { %v2410_v15 = vpop.eup %2409 }
0x1967   :  { %v1465_v7 = vmul.f32 0.5, %v2410_v15 }
0x1969   :  { %v1466_v16 = vadd.f32 0.5, %v1465_v7 }
0x196b   :  { %v1467_v8 = vsel %vm2559_vm4, %v2410_v15, %v1466_v16 }
0x196c   :  { %1470 = vrot.lane.b32.xlu0 %v1467_v8, %s2435_s3  ;;  %v1468_v19 = vmul.f32 %v1467_v8, %v1378_v56 }
0x19de   :  { %v1471_v18 = vpop.permute.xlu0 %1470 }
0x19df   :  { %v1473_v61 = vmul.f32 %v1471_v18, %v1467_v8 }
0x19e1   :  { %1475 = vrot.lane.b32.xlu1 %v1473_v61, %s2436_s25 }
0x1a53   :  { %v1476_v20 = vpop.permute.xlu1 %1475 }
0x1a54   :  { %v1478_v21 = vadd.f32 %v1476_v20, %v1468_v19 }
0x1a56   :  { %2411 = vtanh.f32 %v1478_v21 }
0x1a63   :  { %v2412_v22 = vpop.eup %2411 }
0x1a64   :  { %1481 = vrot.lane.b32.xlu0 %v2412_v22, %s2435_s3 }
0x1ad6   :  { %v1482_v23 = vpop.permute.xlu0 %1481 }
0x1ad7   :  { %v1484_v24 = vmul.f32 %v1482_v23, %v1467_v8  ;;  %v1170_v23 = vadd.f32 %v2802_v6, %v2863_v10 }
0x1ad9   :  { %1487 = vrot.lane.b32.xlu1 %v1484_v24, %s2436_s25 }
0x1b4b   :  { %v1488_v25 = vpop.permute.xlu1 %1487 }
0x1b4c   :  { %2318 = vmatmul.mubr.msk.f32.vlgmr.msra.gmra.mxu1 %vm199_vm5, %v1488_v25 }
0x1b4d   :  { %2332 = vmatpush3.msra.mxu1 %v2747_v50  ;;  %2339 = vmatprep.mubr.msk.f32.mxu1 %vm2434_vm0, %v2433_v0 }
0x1b4e   :  { %2333 = vmatprep.subr.mxu1 %v2433_v0 }
0x1b4f   :  { %2334 = vmatpush3.msra.mxu1 %v2753_v51 }
0x1b50   :  { %2335 = vmatprep.subr.mxu1 %v2433_v0 }
0x1b51   :  { %2336 = vmatpush3.msra.mxu1 %v2760_v52 }
0x1b52   :  { %2337 = vmatprep.subr.mxu1 %v2433_v0 }
0x1b53   :  { %2338 = vmatpush3.msra.mxu1 %v2767_v53 }
0x1b54   :  { %2353 = vmatprep.subr.mxu1 %v2433_v0 }
0x1c0c   :  { %v1557_v27 = vpop.f32.mrf.mxu1 }
0x1c0d   :  { %v1561_v28 = vadd.f32 %v1557_v27, %v1155_v26 }
0x1c0e   :  { %v2319_v29 = vpop.f32.mrf.mxu1 }
0x1c0f   :  { %v1562_v30 = vmul.f32 0.5, %v1561_v28 }
0x1c11   :  { %v1563_v31 = vsel %vm2559_vm4, %v1561_v28, %v1562_v30 }
0x1c12   :  { %2413 = vtanh.f32 %v1563_v31 }
0x1c1f   :  { %v2414_v32 = vpop.eup %2413 }
0x1c20   :  { %v1565_v33 = vmul.f32 0.5, %v2414_v32 }
0x1c22   :  { %v1566_v34 = vadd.f32 0.5, %v1565_v33 }
0x1c24   :  { %v1567_v35 = vsel %vm2559_vm4, %v2414_v32, %v1566_v34 }
0x1c25   :  { %1570 = vrot.lane.b32.xlu0 %v1567_v35, %s2435_s3  ;;  %v1568_v38 = vmul.f32 %v1567_v35, %v1478_v21 }
0x1c97   :  { %v1571_v36 = vpop.permute.xlu0 %1570 }
0x1c98   :  { %v1573_v37 = vmul.f32 %v1571_v36, %v1567_v35 }
0x1c9a   :  { %1575 = vrot.lane.b32.xlu1 %v1573_v37, %s2436_s25 }
0x1d0c   :  { %v1576_v39 = vpop.permute.xlu1 %1575 }
0x1d0d   :  { %v1578_v40 = vadd.f32 %v1576_v39, %v1568_v38 }
0x1d0f   :  { %2415 = vtanh.f32 %v1578_v40 }
0x1d1c   :  { %v2416_v41 = vpop.eup %2415 }
0x1d1d   :  { %1581 = vrot.lane.b32.xlu0 %v2416_v41, %s2435_s3  ;;  %v1175_v41 = vadd.f32 %v2861_v9, %v2802_v6  ;;  %v2048_v6 = vld [vmem:[%s2973_s7] ss:$0 sm:$0xff] }
0x1d8f   :  { %v1582_v42 = vpop.permute.xlu0 %1581 }
0x1d90   :  { %v1584_v43 = vmul.f32 %v1582_v42, %v1567_v35 }
0x1d92   :  { %1587 = vrot.lane.b32.xlu1 %v1584_v43, %s2436_s25 }
0x1e04   :  { %v1588_v44 = vpop.permute.xlu1 %1587 }
0x1e05   :  { %2329 = vmatmul.mubr.msk.f32.vlgmr.msra.gmra.mxu0 %vm199_vm5, %v1588_v44 }
0x1e06   :  { %2343 = vmatpush3.msra.mxu0 %v2747_v50  ;;  %2350 = vmatprep.mubr.msk.f32.mxu0 %vm2434_vm0, %v2433_v0 }
0x1e07   :  { %2344 = vmatprep.subr.mxu0 %v2433_v0 }
0x1e08   :  { %2345 = vmatpush3.msra.mxu0 %v2753_v51 }
0x1e09   :  { %2346 = vmatprep.subr.mxu0 %v2433_v0 }
0x1e0a   :  { %2347 = vmatpush3.msra.mxu0 %v2760_v52 }
0x1e0b   :  { %2348 = vmatprep.subr.mxu0 %v2433_v0 }
0x1e0c   :  { %2349 = vmatpush3.msra.mxu0 %v2767_v53 }
0x1ec5   :  { %v1657_v46 = vpop.f32.mrf.mxu0 }
0x1ec6   :  { %v1661_v1 = vadd.f32 %v1657_v46, %v1160_v45 }
0x1ec7   :  { %v2330_v47 = vpop.f32.mrf.mxu0 }
0x1ec8   :  { %v1662_v48 = vmul.f32 0.5, %v1661_v1 }
0x1eca   :  { %v1663_v49 = vsel %vm2559_vm4, %v1661_v1, %v1662_v48 }
0x1ecb   :  { %2417 = vtanh.f32 %v1663_v49 }
0x1ed8   :  { %v2418_v54 = vpop.eup %2417 }
0x1ed9   :  { %v1665_v55 = vmul.f32 0.5, %v2418_v54 }
0x1edb   :  { %v1666_v56 = vadd.f32 0.5, %v1665_v55 }
0x1edd   :  { %v1667_v57 = vsel %vm2559_vm4, %v2418_v54, %v1666_v56 }
0x1ede   :  { %1670 = vrot.lane.b32.xlu0 %v1667_v57, %s2435_s3  ;;  %v1668_v60 = vmul.f32 %v1667_v57, %v1578_v40 }
0x1f50   :  { %v1671_v58 = vpop.permute.xlu0 %1670 }
0x1f51   :  { %v1673_v59 = vmul.f32 %v1671_v58, %v1667_v57 }
0x1f53   :  { %1675 = vrot.lane.b32.xlu1 %v1673_v59, %s2436_s25 }
0x1fc5   :  { %v1676_v62 = vpop.permute.xlu1 %1675 }
0x1fc6   :  { %v1678_v3 = vadd.f32 %v1676_v62, %v1668_v60 }
0x1fc8   :  { %2419 = vtanh.f32 %v1678_v3 }
0x1fd5   :  { %v2420_v2 = vpop.eup %2419 }
0x1fd6   :  { %1681 = vrot.lane.b32.xlu0 %v2420_v2, %s2435_s3 }
0x2048   :  { %v1682_v11 = vpop.permute.xlu0 %1681 }
0x2049   :  { %v1684_v13 = vmul.f32 %v1682_v11, %v1667_v57 }
0x204b   :  { %1687 = vrot.lane.b32.xlu1 %v1684_v13, %s2436_s25  ;;  %v2049_v13 = vld [vmem:[#allocation4] ss:$0 sm:$0xff] }
0x20bd   :  { %v1688_v4 = vpop.permute.xlu1 %1687 }
0x20be   :  { %2340 = vmatmul.mubr.msk.f32.vlgmr.msra.gmra.mxu1 %vm199_vm5, %v1688_v4 }
0x20bf   :  { %2354 = vmatpush3.msra.mxu1 %v2747_v50  ;;  %2361 = vmatprep.mubr.msk.f32.mxu1 %vm2434_vm0, %v2433_v0 }
0x20c0   :  { %2355 = vmatprep.subr.mxu1 %v2433_v0 }
0x20c1   :  { %2356 = vmatpush3.msra.mxu1 %v2753_v51 }
0x20c2   :  { %2357 = vmatprep.subr.mxu1 %v2433_v0 }
0x20c3   :  { %2358 = vmatpush3.msra.mxu1 %v2760_v52 }
0x20c4   :  { %2359 = vmatprep.subr.mxu1 %v2433_v0 }
0x20c5   :  { %2360 = vmatpush3.msra.mxu1 %v2767_v53 }
0x217e   :  { %v1757_v63 = vpop.f32.mrf.mxu1 }
0x217f   :  { %v1761_v50 = vadd.f32 %v1757_v63, %v1165_v12 }
0x2180   :  { %v2341_v14 = vpop.f32.mrf.mxu1 }
0x2181   :  { %v1762_v15 = vmul.f32 0.5, %v1761_v50 }
0x2183   :  { %v1763_v7 = vsel %vm2559_vm4, %v1761_v50, %v1762_v15 }
0x2184   :  { %2421 = vtanh.f32 %v1763_v7 }
0x2191   :  { %v2422_v51 = vpop.eup %2421 }
0x2192   :  { %v1765_v16 = vmul.f32 0.5, %v2422_v51 }
0x2194   :  { %v1766_v8 = vadd.f32 0.5, %v1765_v16 }
0x2196   :  { %v1767_v52 = vsel %vm2559_vm4, %v2422_v51, %v1766_v8 }
0x2197   :  { %1770 = vrot.lane.b32.xlu0 %v1767_v52, %s2435_s3  ;;  %v1768_v5 = vmul.f32 %v1767_v52, %v1678_v3 }
0x2209   :  { %v1771_v0 = vpop.permute.xlu0 %1770 }
0x220a   :  { %v1773_v53 = vmul.f32 %v1771_v0, %v1767_v52 }
0x220c   :  { %1775 = vrot.lane.b32.xlu1 %v1773_v53, %s2436_s25 }
0x227e   :  { %v1776_v18 = vpop.permute.xlu1 %1775 }
0x227f   :  { %v1778_v61 = vadd.f32 %v1776_v18, %v1768_v5 }
0x2281   :  { %2423 = vtanh.f32 %v1778_v61 }
0x228e   :  { %v2424_v19 = vpop.eup %2423 }
0x228f   :  { %1781 = vrot.lane.b32.xlu0 %v2424_v19, %s2435_s3 }
0x2301   :  { %v1782_v20 = vpop.permute.xlu0 %1781 }
0x2302   :  { %v1784_v21 = vmul.f32 %v1782_v20, %v1767_v52 }
0x2304   :  { %1787 = vrot.lane.b32.xlu1 %v1784_v21, %s2436_s25 }
0x2376   :  { %v1788_v22 = vpop.permute.xlu1 %1787 }
0x2377   :  { %2351 = vmatmul.mubr.msk.f32.vlgmr.msra.gmra.mxu0 %vm199_vm5, %v1788_v22 }
0x2437   :  { %v1857_v24 = vpop.f32.mrf.mxu0 }
0x2438   :  { %v1861_v25 = vadd.f32 %v1857_v24, %v1170_v23 }
0x2439   :  { %v2352_v26 = vpop.f32.mrf.mxu0 }
0x243a   :  { %v1862_v27 = vmul.f32 0.5, %v1861_v25 }
0x243c   :  { %v1863_v28 = vsel %vm2559_vm4, %v1861_v25, %v1862_v27 }
0x243d   :  { %2425 = vtanh.f32 %v1863_v28 }
0x244a   :  { %v2426_v29 = vpop.eup %2425 }
0x244b   :  { %v1865_v30 = vmul.f32 0.5, %v2426_v29 }
0x244d   :  { %v1866_v31 = vadd.f32 0.5, %v1865_v30 }
0x244f   :  { %v1867_v32 = vsel %vm2559_vm4, %v2426_v29, %v1866_v31 }
0x2450   :  { %1870 = vrot.lane.b32.xlu0 %v1867_v32, %s2435_s3  ;;  %v1868_v10 = vmul.f32 %v1867_v32, %v1778_v61 }
0x24c2   :  { %v1871_v33 = vpop.permute.xlu0 %1870 }
0x24c3   :  { %v1873_v34 = vmul.f32 %v1871_v33, %v1867_v32 }
0x24c5   :  { %1875 = vrot.lane.b32.xlu1 %v1873_v34, %s2436_s25 }
0x2537   :  { %v1876_v35 = vpop.permute.xlu1 %1875 }
0x2538   :  { %v1878_v36 = vadd.f32 %v1876_v35, %v1868_v10 }
0x253a   :  { %2427 = vtanh.f32 %v1878_v36 }
0x2547   :  { %v2428_v37 = vpop.eup %2427 }
0x2548   :  { %1881 = vrot.lane.b32.xlu0 %v2428_v37, %s2435_s3 }
0x25ba   :  { %v1882_v38 = vpop.permute.xlu0 %1881 }
0x25bb   :  { %v1884_v39 = vmul.f32 %v1882_v38, %v1867_v32 }
0x25bd   :  { %1887 = vrot.lane.b32.xlu1 %v1884_v39, %s2436_s25 }
0x262f   :  { %v1888_v40 = vpop.permute.xlu1 %1887 }
0x2630   :  { %2362 = vmatmul.mubr.msk.f32.vlgmr.msra.gmra.mxu1 %vm199_vm5, %v1888_v40 }
0x26f0   :  { %v1957_v42 = vpop.f32.mrf.mxu1 }
0x26f1   :  { %v1961_v43 = vadd.f32 %v1957_v42, %v1175_v41 }
0x26f2   :  { %v2363_v44 = vpop.f32.mrf.mxu1 }
0x26f3   :  { %v1962_v45 = vmul.f32 0.5, %v1961_v43 }
0x26f5   :  { %v1963_v46 = vsel %vm2559_vm4, %v1961_v43, %v1962_v45 }
0x26f6   :  { %2429 = vtanh.f32 %v1963_v46 }
0x2703   :  { %v2430_v1 = vpop.eup %2429 }
0x2704   :  { %v1965_v47 = vmul.f32 0.5, %v2430_v1 }
0x2706   :  { %v1966_v48 = vadd.f32 0.5, %v1965_v47 }
0x2708   :  { %v1967_v49 = vsel %vm2559_vm4, %v2430_v1, %v1966_v48 }
0x2709   :  { %1970 = vrot.lane.b32.xlu0 %v1967_v49, %s2435_s3  ;;  %v1968_v9 = vmul.f32 %v1967_v49, %v1878_v36 }
0x277b   :  { %v1971_v54 = vpop.permute.xlu0 %1970 }
0x277c   :  { %v1973_v55 = vmul.f32 %v1971_v54, %v1967_v49 }
0x277e   :  { %1975 = vrot.lane.b32.xlu1 %v1973_v55, %s2436_s25 }
0x2782   :  { %1991 = vrot.lane.b32.xlu1 %v2048_v6, %s2437_s11 }
0x27f0   :  { %v1976_v56 = vpop.permute.xlu1 %1975 }
0x27f1   :  { %v1978_v57 = vadd.f32 %v1976_v56, %v1968_v9 }
0x27f3   :  { %2431 = vtanh.f32 %v1978_v57 }
0x27f4   :  { %v1992_v60 = vpop.permute.xlu1 %1991 }
0x2800   :  { %v2432_v58 = vpop.eup %2431 }
0x2801   :  { %1981 = vrot.lane.b32.xlu0 %v2432_v58, %s2435_s3 }
0x2873   :  { %v1982_v59 = vpop.permute.xlu0 %1981 }
0x2874   :  { %v1984_v62 = vmul.f32 %v1982_v59, %v1967_v49 }
0x2876   :  { %v1994_v3 = vmul.f32 %v1992_v60, %v1984_v62 }
0x2878   :  { %1996 = vrot.lane.b32.xlu0 %v1994_v3, %s2436_s25 }
0x28ea   :  { %v1997_v2 = vpop.permute.xlu0 %1996 }
0x28eb   :  { %v1999_v11 = vsel %vm199_vm5, %v1997_v2, 0.0 }
0x28ec   :  { %2000 = vadd.xlane.f32.xlu1 %v1999_v11 }
0x2975   :  { %v2001_v4 = vpop.xlane.xlu1 %2000 }
0x2976   :  { %v2009_v12 = vadd.f32 %v2049_v13, %v2001_v4 }
0x2978   :  { %2011 = vst.msk [vmem:[%s2975_s9] sm:$0xff] %vm2010_vm6, %v2009_v12 }

</bundles_post_ra>
